<compile_context>
chip_gen: v5e
topology: v5e:2x2
jax: 0.10.0
libtpu: 0.0.40
codegen_flags: <defaults>
</compile_context>

<pallas_src>
import math

import jax
import jax.numpy as jnp
import numpy as np
from jax.experimental import pallas as pl
from jax.experimental.pallas import tpu as pltpu

# ---------------- small config consistent with the module ----------------
BATCH = 4
D_NUMERICAL = 7              # numerical features; categorical features: none
N_TOKENS = D_NUMERICAL + 1   # [CLS]/readout token + numerical features
D_TOKEN = 32
N_HEADS = 4
D_HEAD = D_TOKEN // N_HEADS
D_FFN_FACTOR = 2.0
D_HIDDEN = int(D_TOKEN * D_FFN_FACTOR)
N_LAYERS = 2
D_OUT = 1
N_COLS = D_NUMERICAL + 1     # n_cols = n + 1 in MultiheadGEAttention
D_COL = math.ceil(2 * math.log2(N_COLS))
LN_EPS = 1e-5

K_EXP = N_HEADS * N_TOKENS   # width of the head-expanded attention axis
OUT_PAD = 128                # lane-dense output width

# TODO(synk): categorical-embedding path of the Tokenizer not implemented
# (this configuration has no categorical features, matching categories == []).


def _full_spec(shape):
    """BlockSpec passing the whole (small) array untiled into VMEM."""
    nd = len(shape)
    return pl.BlockSpec(shape, lambda i, nd=nd: (0,) * nd)


# ----------- FR-graph topology (parameter-only -> plain-JAX glue) ----------
def compute_adj_mask(col_head, col_tail, adj_bias, n_head_nodes):
    """_get_topology: sigmoid -> no-self-interaction -> prune-to-readout -> threshold.
    frozen=False uses a straight-through trick; its *forward value* equals hard adj."""
    def l2norm(v):
        n = jnp.sqrt(jnp.sum(v * v, axis=-1, keepdims=True))
        return v / jnp.maximum(n, 1e-12)
    ch, ct = l2norm(col_head), l2norm(col_tail)
    top = jnp.einsum('hic,hjc->hij', ch, ct)
    probs = jax.nn.sigmoid(top + adj_bias)
    n_cols = col_head.shape[1]
    if n_cols > 1:                                  # nsi
        probs = probs * (1.0 - jnp.eye(n_cols, dtype=probs.dtype))
    col_mask = jnp.ones((n_cols,), probs.dtype).at[0].set(0.0)   # prune edges to readout
    probs = probs * col_mask
    adj = (probs > 0.5).astype(jnp.float32)
    adj = adj[:, :n_head_nodes]
    # TODO(synk): straight-through estimator (detach) only affects gradients; fwd-only here.
    return (1.0 - adj) * -10000.0


# --------------------------- parameter slab packing -------------------------
_ROW_ALIGN = 8
_SLAB_W = 128


def _build_slab(entries):
    """Pack a list of (name, 2-D f32 array with width <= 128) into one
    (rows, 128) slab.  Returns (slab, offsets) with offsets[name] = (row, r, c)."""
    offsets = {}
    blocks = []
    row = 0
    for name, arr in entries:
        a = jnp.asarray(arr, jnp.float32)
        r, c = a.shape
        assert c <= _SLAB_W, (name, a.shape)
        offsets[name] = (row, r, c)
        if c < _SLAB_W:
            a = jnp.concatenate([a, jnp.zeros((r, _SLAB_W - c), jnp.float32)], axis=1)
        rpad = (-r) % _ROW_ALIGN
        if rpad:
            a = jnp.concatenate([a, jnp.zeros((rpad, _SLAB_W), jnp.float32)], axis=0)
        blocks.append(a)
        row += r + rpad
    return jnp.concatenate(blocks, axis=0), offsets


def pack_params(params):
    H, D, dh, T = N_HEADS, D_TOKEN, D_HEAD, N_TOKENS
    K = H * T

    # constant masks used inside the kernel
    hmask = (np.arange(H)[:, None] == (np.arange(D) // dh)[None, :]).astype(np.float32)
    hmaskk = np.repeat(hmask, T, axis=0)                          # (K, D): row k=(h,j) -> head h lanes
    seg = np.arange(K) // T
    gmat = (seg[:, None] == seg[None, :]).astype(np.float32)      # (K, K) block-diag segment sum

    head_w_pad = np.zeros((D, OUT_PAD), np.float32)
    head_w_pad[:, 0] = np.asarray(params['head_w'][:, 0])
    head_b_pad = np.zeros((1, OUT_PAD), np.float32)
    head_b_pad[0, 0] = float(params['head_b'][0, 0])

    entries = [
        ('tok_w', params['tok_w']),                               # (T, D)
        ('tok_b', params['tok_b']),                               # (T, D)
        ('hmaskk', hmaskk),                                       # (K, D)
        ('gmat', gmat),                                           # (K, K)
        ('ln_g', params['ln_g']),
        ('ln_b', params['ln_b']),
        ('head_w', head_w_pad),                                   # (D, 128)
        ('head_b', head_b_pad),                                   # (1, 128)
    ]
    n_layers = len(params['layers'])
    for li, lp in enumerate(params['layers']):
        n_head = 1 if li + 1 == n_layers else T
        adjm = compute_adj_mask(lp['col_head'], lp['col_tail'], lp['adj_bias'], n_head)
        # adj2[i, h*T + j] = adjm[h, i, j]  (matches the head-expanded score layout)
        adj2 = jnp.transpose(adjm, (1, 0, 2)).reshape(n_head, K)
        entries += [
            (f'whv{li}', jnp.concatenate([lp['wh'], lp['wv']], axis=1)),   # (D, 2D)
            (f'bhv{li}', jnp.concatenate([lp['bh'], lp['bv']], axis=1)),   # (1, 2D)
            (f'rel{li}', lp['rel']),
            (f'g0{li}', lp['g0']), (f'be0{li}', lp['be0']),
            (f'g1{li}', lp['g1']), (f'be1{li}', lp['be1']),
            (f'wo{li}', lp['wo']), (f'bo{li}', lp['bo']),
            (f'w0{li}', lp['w0']), (f'b0{li}', lp['b0']),                  # (D, 2*DH), (1, 2*DH)
            (f'w1{li}', lp['w1']), (f'b1{li}', lp['b1']),                  # (DH, D), (1, D)
            (f'adj{li}', adj2),                                            # (n_head, K)
        ]
    return _build_slab(entries)


# --------------------------- fused forward kernel ---------------------------
def _make_fused_kernel(n_layers, offsets):
    B, T, D, H, DH = BATCH, N_TOKENS, D_TOKEN, N_HEADS, D_HIDDEN
    dh = D // H
    K = H * T
    scale = 1.0 / math.sqrt(dh)

    def ln(v, g, b):
        mu = jnp.mean(v, axis=-1, keepdims=True)
        var = jnp.mean((v - mu) ** 2, axis=-1, keepdims=True)
        return (v - mu) * jax.lax.rsqrt(var + LN_EPS) * g + b

    def kernel(xin_ref, slab_ref, out_ref):
        def load(name):
            r0, r, c = offsets[name]
            return slab_ref[r0:r0 + r, 0:c]

        hmaskk = load('hmaskk')                              # (K, D)
        gmat = load('gmat')                                  # (K, K)

        # ---- tokenizer (FT-Transformer, [CLS] value prepended as 1.0) ----
        xin = xin_ref[...]                                   # (B, T)
        tok_w = load('tok_w')                                # (T, D)
        tok_b = load('tok_b')                                # (T, D)
        x2 = (tok_w[None] * xin[:, :, None] + tok_b[None]).reshape(B * T, D)

        # ---- transformer layers (statically unrolled) ----
        Tin = T
        for li in range(n_layers):
            is_last = li + 1 == n_layers
            n_head = 1 if is_last else Tin                   # query/head nodes this layer

            w_hv = load(f'whv{li}')                          # (D, 2D)  [W_head | W_v]
            b_hv = load(f'bhv{li}')                          # (1, 2D)
            rel = load(f'rel{li}')                           # (1, D) flattened rel_emb
            wo = load(f'wo{li}'); bo = load(f'bo{li}')
            w0 = load(f'w0{li}'); b0 = load(f'b0{li}')
            w1 = load(f'w1{li}'); b1 = load(f'b1{li}')
            g1 = load(f'g1{li}'); be1 = load(f'be1{li}')
            adj2 = load(f'adj{li}')                          # (n_head, K)

            # prenorm (layer 0 has no norm0); batch folded into rows
            if li > 0:
                xr = ln(x2, load(f'g0{li}'), load(f'be0{li}'))
            else:
                xr = x2

            # one packed projection: f_tail || f_v  (sym_weight: f_head = slice of f_tail)
            f_all = jnp.dot(xr, w_hv, preferred_element_type=jnp.float32) + b_hv
            f_t3 = f_all[:, 0:D].reshape(B, Tin, D)
            f_v3 = f_all[:, D:2 * D].reshape(B, Tin, D)

            # readout-row slice first, then diag(rel_emb)
            f_h3 = (f_t3 if n_head == Tin else f_t3[:, 0:n_head, :]) * rel[None]   # (B, n_head, D)

            # masked head expansion: column k = (h, j) carries token j on head h's lanes,
            # so ONE batched matmul produces every head's scores / values.
            f_t_exp = jnp.broadcast_to(f_t3[:, None, :, :], (B, H, Tin, D)
                                       ).reshape(B, K, D) * hmaskk[None]
            f_v_exp = jnp.broadcast_to(f_v3[:, None, :, :], (B, H, Tin, D)
                                       ).reshape(B, K, D) * hmaskk[None]

            ws = jnp.einsum('bid,bkd->bik', f_h3, f_t_exp,
                            preferred_element_type=jnp.float32) * scale            # (B, n_head, K)
            logits = ws + adj2[None]

            # segment-wise stable softmax over each head's Tin-wide slice:
            # per-segment max (needed to match the reference exactly when a row is fully
            # FR-masked), then a single exp / MXU segment-sum / approx reciprocal.
            shifted = []
            for h in range(H):
                seg = logits[:, :, h * Tin:(h + 1) * Tin]
                shifted.append(seg - jnp.max(seg, axis=-1, keepdims=True))
            e = jnp.exp(jnp.concatenate(shifted, axis=-1))                          # (B, n_head, K)
            denom = jnp.dot(e.reshape(B * n_head, K), gmat,
                            preferred_element_type=jnp.float32).reshape(B, n_head, K)
            fr = e * pl.reciprocal(denom, approx=True)

            # weighted values come out already merged over heads (no concat / relayout)
            attn = jnp.einsum('bik,bkd->bid', fr, f_v_exp,
                              preferred_element_type=jnp.float32)                   # (B, n_head, D)
            attn2 = jnp.dot(attn.reshape(B * n_head, D), wo,
                            preferred_element_type=jnp.float32) + bo

            if n_head == Tin:
                x_res = x2
            else:
                x_res = x2.reshape(B, Tin, D)[:, 0:n_head, :].reshape(B * n_head, D)
            x_att = x_res + attn2                            # residual 0 (prenorm)

            # FFN with reglu
            xr2 = ln(x_att, g1, be1)
            hdn = jnp.dot(xr2, w0, preferred_element_type=jnp.float32) + b0
            act = hdn[:, 0:DH] * jnp.maximum(hdn[:, DH:2 * DH], 0.0)
            ffn = jnp.dot(act, w1, preferred_element_type=jnp.float32) + b1
            x2 = x_att + ffn                                 # residual 1, (B*n_head, D)
            Tin = n_head

        # ---- head (readout token; last layer left exactly one token per sample) ----
        ln_g = load('ln_g')
        ln_b = load('ln_b')
        hw = load('head_w')                                  # (D, 128), real weight in col 0
        hb = load('head_b')                                  # (1, 128), real bias in col 0
        xa = jnp.maximum(ln(x2, ln_g, ln_b), 0.0)            # last_activation = relu
        out_ref[...] = jnp.dot(xa, hw, preferred_element_type=jnp.float32) + hb

    return kernel


def make_t2gformer_forward(offsets, n_layers):
    kernel = _make_fused_kernel(n_layers, offsets)

    def forward(x_all, slab):
        B = x_all.shape[0]
        xin = jnp.concatenate([jnp.ones((B, 1), jnp.float32), x_all], axis=1)  # prepend [CLS]
        out = pl.pallas_call(
            kernel,
            out_shape=jax.ShapeDtypeStruct((B, OUT_PAD), jnp.float32),
            grid=(1,),
            in_specs=[_full_spec(xin.shape), _full_spec(slab.shape)],
            out_specs=_full_spec((B, OUT_PAD)),
            compiler_params=pltpu.CompilerParams(dimension_semantics=("arbitrary",)),
        )(xin, slab)
        return out[:, 0]

    return jax.jit(forward)


# ------------------------- deterministic parameters ------------------------
def init_params(key):
    keys = iter(jax.random.split(key, 128))

    def u(shape, scale=0.2):
        return jax.random.uniform(next(keys), shape, jnp.float32, -scale, scale)

    params = {
        'tok_w': u((N_TOKENS, D_TOKEN)),
        'tok_b': jnp.concatenate([jnp.zeros((1, D_TOKEN), jnp.float32),
                                  u((N_TOKENS - 1, D_TOKEN))], axis=0),
        'ln_g': jnp.ones((1, D_TOKEN), jnp.float32),
        'ln_b': jnp.zeros((1, D_TOKEN), jnp.float32),
        'head_w': u((D_TOKEN, D_OUT)),
        'head_b': u((1, D_OUT)),
        'layers': [],
    }
    for _ in range(N_LAYERS):
        lp = {
            'wh': u((D_TOKEN, D_TOKEN)),                   # W_head == W_tail (sym_weight)
            'bh': jnp.zeros((1, D_TOKEN), jnp.float32),    # torch zero-inits bias
            'wv': u((D_TOKEN, D_TOKEN)),
            'bv': jnp.zeros((1, D_TOKEN), jnp.float32),
            'rel': jnp.ones((1, D_TOKEN), jnp.float32),    # rel_emb init = ones, flattened
            'wo': u((D_TOKEN, D_TOKEN)),
            'bo': jnp.zeros((1, D_TOKEN), jnp.float32),
            'col_head': u((N_HEADS, N_COLS, D_COL), 0.5),
            'col_tail': u((N_HEADS, N_COLS, D_COL), 0.5),
            'adj_bias': 0.0,                               # self.bias = zeros(1)
            'g0': jnp.ones((1, D_TOKEN), jnp.float32),
            'be0': jnp.zeros((1, D_TOKEN), jnp.float32),
            'g1': jnp.ones((1, D_TOKEN), jnp.float32),
            'be1': jnp.zeros((1, D_TOKEN), jnp.float32),
            'w0': u((D_TOKEN, 2 * D_HIDDEN)),              # linear0 (reglu -> 2x hidden)
            'b0': u((1, 2 * D_HIDDEN)),
            'w1': u((D_HIDDEN, D_TOKEN)),                  # linear1
            'b1': u((1, D_TOKEN)),
        }
        params['layers'].append(lp)
    return params


# ----------------------------- pure-JAX reference ---------------------------
def reference_forward(x_all, params):
    B = x_all.shape[0]

    def ln(v, g, b):
        mu = jnp.mean(v, axis=-1, keepdims=True)
        var = jnp.mean((v - mu) ** 2, axis=-1, keepdims=True)
        return (v - mu) / jnp.sqrt(var + LN_EPS) * g + b

    xin = jnp.concatenate([jnp.ones((B, 1), jnp.float32), x_all], axis=1)
    x = params['tok_w'][None] * xin[:, :, None] + params['tok_b'][None]
    n_layers = len(params['layers'])
    for li, lp in enumerate(params['layers']):
        is_last = li + 1 == n_layers
        xr = ln(x, lp['g0'], lp['be0']) if li > 0 else x
        x_head_in = xr[:, :1] if is_last else xr
        f_head = x_head_in @ lp['wh'] + lp['bh']
        f_tail = xr @ lp['wh'] + lp['bh']
        f_v = xr @ lp['wv'] + lp['bv']

        def resh(t):
            return t.reshape(B, t.shape[1], N_HEADS, D_HEAD).transpose(0, 2, 1, 3)

        fh, ft, fv = resh(f_head), resh(f_tail), resh(f_v)
        rel = lp['rel'].reshape(N_HEADS, D_HEAD)
        ws = jnp.einsum('bhid,hd,bhjd->bhij', fh, rel, ft) / math.sqrt(D_HEAD)
        n_head_nodes = 1 if is_last else x.shape[1]
        adj_mask = compute_adj_mask(lp['col_head'], lp['col_tail'], lp['adj_bias'], n_head_nodes)
        fr = jax.nn.softmax(ws + adj_mask[None], axis=-1)
        o = jnp.einsum('bhij,bhjd->bhid', fr, fv)
        o = o.transpose(0, 2, 1, 3).reshape(B, n_head_nodes, D_TOKEN)
        o = o @ lp['wo'] + lp['bo']
        x = x[:, :n_head_nodes] + o
        xr2 = ln(x, lp['g1'], lp['be1'])
        hdn = xr2 @ lp['w0'] + lp['b0']
        a, bb = hdn[..., :D_HIDDEN], hdn[..., D_HIDDEN:]
        hdn = a * jax.nn.relu(bb)
        x = x + hdn @ lp['w1'] + lp['b1']
    x0 = x[:, 0]
    x0 = ln(x0, params['ln_g'], params['ln_b'])
    x0 = jax.nn.relu(x0)
    out = x0 @ params['head_w'] + params['head_b']
    return out[:, 0]


if __name__ == "__main__":
    key = jax.random.PRNGKey(0)
    pkey, xkey = jax.random.split(key)
    params = init_params(pkey)
    slab, offsets = pack_params(params)
    x_all = jax.random.normal(xkey, (BATCH, D_NUMERICAL), jnp.float32)

    fwd = make_t2gformer_forward(offsets, N_LAYERS)
    out = jax.block_until_ready(fwd(x_all, slab))
    ref = jax.block_until_ready(reference_forward(x_all, params))

    assert out.shape == (BATCH,), out.shape
    if not np.allclose(np.asarray(out), np.asarray(ref), atol=2e-3, rtol=2e-3):
        raise AssertionError(f"Pallas vs reference mismatch:\n{out}\n{ref}")
    print("KERNEL_OK")
</pallas_src>

<mosaic_0001>
module attributes {stable_mosaic.version = 11 : i64} {
  func.func @kernel(%arg0: i32, %arg1: memref<4x8xf32, #tpu.memory_space<vmem>>, %arg2: memref<616x128xf32, #tpu.memory_space<vmem>>, %arg3: memref<4x128xf32, #tpu.memory_space<vmem>>) attributes {dimension_semantics = [#tpu.dimension_semantics<arbitrary>], iteration_bounds = array<i64: 1>, scalar_prefetch = 0 : i64, scratch_operands = 0 : i64, tpu.core_type = #tpu.core_type<tc>, window_params = [{pipeline_mode = #tpu.pipeline_mode<synchronous>, transform_indices = @transform_0, window_bounds = array<i64: 4, 8>}, {pipeline_mode = #tpu.pipeline_mode<synchronous>, transform_indices = @transform_1, window_bounds = array<i64: 616, 128>}, {pipeline_mode = #tpu.pipeline_mode<synchronous>, transform_indices = @transform_2, window_bounds = array<i64: 4, 128>}]} {
    %c16 = arith.constant 16 : index
    %c0 = arith.constant 0 : index
    %0 = vector.load %arg2[%c16, %c0] : memref<616x128xf32, #tpu.memory_space<vmem>>, vector<32x32xf32>
    %c48 = arith.constant 48 : index
    %c0_0 = arith.constant 0 : index
    %1 = vector.load %arg2[%c48, %c0_0] : memref<616x128xf32, #tpu.memory_space<vmem>>, vector<32x32xf32>
    %c0_1 = arith.constant 0 : index
    %c0_2 = arith.constant 0 : index
    %2 = vector.load %arg1[%c0_1, %c0_2] : memref<4x8xf32, #tpu.memory_space<vmem>>, vector<4x8xf32>
    %c0_3 = arith.constant 0 : index
    %c0_4 = arith.constant 0 : index
    %3 = vector.load %arg2[%c0_3, %c0_4] : memref<616x128xf32, #tpu.memory_space<vmem>>, vector<8x32xf32>
    %c8 = arith.constant 8 : index
    %c0_5 = arith.constant 0 : index
    %4 = vector.load %arg2[%c8, %c0_5] : memref<616x128xf32, #tpu.memory_space<vmem>>, vector<8x32xf32>
    %5 = vector.shape_cast %3 : vector<8x32xf32> to vector<1x8x32xf32>
    %6 = vector.shape_cast %2 : vector<4x8xf32> to vector<4x8x1xf32>
    %7 = vector.broadcast %5 : vector<1x8x32xf32> to vector<4x8x32xf32>
    %8 = vector.broadcast %6 : vector<4x8x1xf32> to vector<4x8x32xf32>
    %9 = arith.mulf %7, %8 : vector<4x8x32xf32>
    %10 = vector.shape_cast %4 : vector<8x32xf32> to vector<1x8x32xf32>
    %11 = vector.broadcast %10 : vector<1x8x32xf32> to vector<4x8x32xf32>
    %12 = arith.addf %9, %11 : vector<4x8x32xf32>
    %13 = vector.shape_cast %12 : vector<4x8x32xf32> to vector<32x32xf32>
    %c136 = arith.constant 136 : index
    %c0_6 = arith.constant 0 : index
    %14 = vector.load %arg2[%c136, %c0_6] : memref<616x128xf32, #tpu.memory_space<vmem>>, vector<32x64xf32>
    %c168 = arith.constant 168 : index
    %c0_7 = arith.constant 0 : index
    %15 = vector.load %arg2[%c168, %c0_7] : memref<616x128xf32, #tpu.memory_space<vmem>>, vector<1x64xf32>
    %c176 = arith.constant 176 : index
    %c0_8 = arith.constant 0 : index
    %16 = vector.load %arg2[%c176, %c0_8] : memref<616x128xf32, #tpu.memory_space<vmem>>, vector<1x32xf32>
    %c216 = arith.constant 216 : index
    %c0_9 = arith.constant 0 : index
    %17 = vector.load %arg2[%c216, %c0_9] : memref<616x128xf32, #tpu.memory_space<vmem>>, vector<32x32xf32>
    %c248 = arith.constant 248 : index
    %c0_10 = arith.constant 0 : index
    %18 = vector.load %arg2[%c248, %c0_10] : memref<616x128xf32, #tpu.memory_space<vmem>>, vector<1x32xf32>
    %c256 = arith.constant 256 : index
    %c0_11 = arith.constant 0 : index
    %19 = vector.load %arg2[%c256, %c0_11] : memref<616x128xf32, #tpu.memory_space<vmem>>, vector<32x128xf32>
    %c288 = arith.constant 288 : index
    %c0_12 = arith.constant 0 : index
    %20 = vector.load %arg2[%c288, %c0_12] : memref<616x128xf32, #tpu.memory_space<vmem>>, vector<1x128xf32>
    %c296 = arith.constant 296 : index
    %c0_13 = arith.constant 0 : index
    %21 = vector.load %arg2[%c296, %c0_13] : memref<616x128xf32, #tpu.memory_space<vmem>>, vector<64x32xf32>
    %c360 = arith.constant 360 : index
    %c0_14 = arith.constant 0 : index
    %22 = vector.load %arg2[%c360, %c0_14] : memref<616x128xf32, #tpu.memory_space<vmem>>, vector<1x32xf32>
    %c200 = arith.constant 200 : index
    %c0_15 = arith.constant 0 : index
    %23 = vector.load %arg2[%c200, %c0_15] : memref<616x128xf32, #tpu.memory_space<vmem>>, vector<1x32xf32>
    %c208 = arith.constant 208 : index
    %c0_16 = arith.constant 0 : index
    %24 = vector.load %arg2[%c208, %c0_16] : memref<616x128xf32, #tpu.memory_space<vmem>>, vector<1x32xf32>
    %c368 = arith.constant 368 : index
    %c0_17 = arith.constant 0 : index
    %25 = vector.load %arg2[%c368, %c0_17] : memref<616x128xf32, #tpu.memory_space<vmem>>, vector<8x32xf32>
    %cst = arith.constant dense<0.000000e+00> : vector<32x64xf32>
    %26 = tpu.matmul %13, %14, %cst {dimension_numbers = #tpu.dot_dimension_numbers<[1], [0], [0], [1], [0, 0, 1, 1], [], []>} : vector<32x32xf32>, vector<32x64xf32>, vector<32x64xf32> -> vector<32x64xf32>
    %27 = vector.broadcast %15 : vector<1x64xf32> to vector<32x64xf32>
    %28 = arith.addf %26, %27 : vector<32x64xf32>
    %29 = vector.extract_strided_slice %28 {offsets = [0, 0], sizes = [32, 32], strides = [1, 1]} : vector<32x64xf32> to vector<32x32xf32>
    %30 = vector.shape_cast %29 : vector<32x32xf32> to vector<4x8x32xf32>
    %31 = vector.extract_strided_slice %28 {offsets = [0, 32], sizes = [32, 32], strides = [1, 1]} : vector<32x64xf32> to vector<32x32xf32>
    %32 = vector.shape_cast %31 : vector<32x32xf32> to vector<4x8x32xf32>
    %33 = vector.shape_cast %16 : vector<1x32xf32> to vector<1x1x32xf32>
    %34 = vector.broadcast %33 : vector<1x1x32xf32> to vector<4x8x32xf32>
    %35 = arith.mulf %30, %34 : vector<4x8x32xf32>
    %36 = vector.shape_cast %30 : vector<4x8x32xf32> to vector<4x1x8x32xf32>
    %37 = vector.shape_cast %36 : vector<4x1x8x32xf32> to vector<4x1x8x32xf32>
    %38 = vector.broadcast %37 : vector<4x1x8x32xf32> to vector<4x4x8x32xf32>
    %39 = vector.shape_cast %38 : vector<4x4x8x32xf32> to vector<4x32x32xf32>
    %40 = vector.shape_cast %0 : vector<32x32xf32> to vector<1x32x32xf32>
    %41 = vector.broadcast %40 : vector<1x32x32xf32> to vector<4x32x32xf32>
    %42 = arith.mulf %39, %41 : vector<4x32x32xf32>
    %43 = vector.shape_cast %32 : vector<4x8x32xf32> to vector<4x1x8x32xf32>
    %44 = vector.shape_cast %43 : vector<4x1x8x32xf32> to vector<4x1x8x32xf32>
    %45 = vector.broadcast %44 : vector<4x1x8x32xf32> to vector<4x4x8x32xf32>
    %46 = vector.shape_cast %45 : vector<4x4x8x32xf32> to vector<4x32x32xf32>
    %47 = vector.shape_cast %0 : vector<32x32xf32> to vector<1x32x32xf32>
    %48 = vector.broadcast %47 : vector<1x32x32xf32> to vector<4x32x32xf32>
    %49 = arith.mulf %46, %48 : vector<4x32x32xf32>
    "tpu.trace_start"() <{level = 10 : i32, message = "bid,bkd->bik"}> : () -> ()
    %cst_18 = arith.constant dense<0.000000e+00> : vector<4x8x32xf32>
    %50 = tpu.matmul %35, %42, %cst_18 {dimension_numbers = #tpu.dot_dimension_numbers<[2], [2], [1], [1], [0, 0, 0, 1, 1, 1], [0], [0]>} : vector<4x8x32xf32>, vector<4x32x32xf32>, vector<4x8x32xf32> -> vector<4x8x32xf32>
    "tpu.trace_stop"() : () -> ()
    %cst_19 = arith.constant 0.353553385 : f32
    %51 = vector.broadcast %cst_19 : f32 to vector<4x8x32xf32>
    %52 = arith.mulf %50, %51 : vector<4x8x32xf32>
    %53 = vector.shape_cast %25 : vector<8x32xf32> to vector<1x8x32xf32>
    %54 = vector.broadcast %53 : vector<1x8x32xf32> to vector<4x8x32xf32>
    %55 = arith.addf %52, %54 : vector<4x8x32xf32>
    %56 = vector.extract_strided_slice %55 {offsets = [0, 0, 0], sizes = [4, 8, 8], strides = [1, 1, 1]} : vector<4x8x32xf32> to vector<4x8x8xf32>
    %cst_20 = arith.constant dense<0xFF800000> : vector<4x8xf32>
    %57 = vector.multi_reduction <maximumf>, %56, %cst_20 [2] : vector<4x8x8xf32> to vector<4x8xf32>
    %58 = vector.shape_cast %57 : vector<4x8xf32> to vector<4x8x1xf32>
    %59 = vector.broadcast %58 : vector<4x8x1xf32> to vector<4x8x8xf32>
    %60 = arith.subf %56, %59 : vector<4x8x8xf32>
    %61 = vector.extract_strided_slice %55 {offsets = [0, 0, 8], sizes = [4, 8, 8], strides = [1, 1, 1]} : vector<4x8x32xf32> to vector<4x8x8xf32>
    %cst_21 = arith.constant dense<0xFF800000> : vector<4x8xf32>
    %62 = vector.multi_reduction <maximumf>, %61, %cst_21 [2] : vector<4x8x8xf32> to vector<4x8xf32>
    %63 = vector.shape_cast %62 : vector<4x8xf32> to vector<4x8x1xf32>
    %64 = vector.broadcast %63 : vector<4x8x1xf32> to vector<4x8x8xf32>
    %65 = arith.subf %61, %64 : vector<4x8x8xf32>
    %66 = vector.extract_strided_slice %55 {offsets = [0, 0, 16], sizes = [4, 8, 8], strides = [1, 1, 1]} : vector<4x8x32xf32> to vector<4x8x8xf32>
    %cst_22 = arith.constant dense<0xFF800000> : vector<4x8xf32>
    %67 = vector.multi_reduction <maximumf>, %66, %cst_22 [2] : vector<4x8x8xf32> to vector<4x8xf32>
    %68 = vector.shape_cast %67 : vector<4x8xf32> to vector<4x8x1xf32>
    %69 = vector.broadcast %68 : vector<4x8x1xf32> to vector<4x8x8xf32>
    %70 = arith.subf %66, %69 : vector<4x8x8xf32>
    %71 = vector.extract_strided_slice %55 {offsets = [0, 0, 24], sizes = [4, 8, 8], strides = [1, 1, 1]} : vector<4x8x32xf32> to vector<4x8x8xf32>
    %cst_23 = arith.constant dense<0xFF800000> : vector<4x8xf32>
    %72 = vector.multi_reduction <maximumf>, %71, %cst_23 [2] : vector<4x8x8xf32> to vector<4x8xf32>
    %73 = vector.shape_cast %72 : vector<4x8xf32> to vector<4x8x1xf32>
    %74 = vector.broadcast %73 : vector<4x8x1xf32> to vector<4x8x8xf32>
    %75 = arith.subf %71, %74 : vector<4x8x8xf32>
    %76 = tpu.concatenate %60, %65, %70, %75 in 2 : vector<4x8x8xf32>, vector<4x8x8xf32>, vector<4x8x8xf32>, vector<4x8x8xf32> -> vector<4x8x32xf32>
    %77 = math.exp %76 : vector<4x8x32xf32>
    %78 = vector.shape_cast %77 : vector<4x8x32xf32> to vector<32x32xf32>
    %cst_24 = arith.constant dense<0.000000e+00> : vector<32x32xf32>
    %79 = tpu.matmul %78, %1, %cst_24 {dimension_numbers = #tpu.dot_dimension_numbers<[1], [0], [0], [1], [0, 0, 1, 1], [], []>} : vector<32x32xf32>, vector<32x32xf32>, vector<32x32xf32> -> vector<32x32xf32>
    %80 = vector.shape_cast %79 : vector<32x32xf32> to vector<4x8x32xf32>
    %81 = tpu.reciprocal %80 {approx = true} : vector<4x8x32xf32> -> vector<4x8x32xf32>
    %82 = arith.mulf %77, %81 : vector<4x8x32xf32>
    "tpu.trace_start"() <{level = 10 : i32, message = "bik,bkd->bid"}> : () -> ()
    %cst_25 = arith.constant dense<0.000000e+00> : vector<4x8x32xf32>
    %83 = tpu.matmul %82, %49, %cst_25 {dimension_numbers = #tpu.dot_dimension_numbers<[2], [1], [1], [2], [0, 0, 0, 1, 1, 2], [0], [0]>} : vector<4x8x32xf32>, vector<4x32x32xf32>, vector<4x8x32xf32> -> vector<4x8x32xf32>
    "tpu.trace_stop"() : () -> ()
    %84 = vector.shape_cast %83 : vector<4x8x32xf32> to vector<32x32xf32>
    %cst_26 = arith.constant dense<0.000000e+00> : vector<32x32xf32>
    %85 = tpu.matmul %84, %17, %cst_26 {dimension_numbers = #tpu.dot_dimension_numbers<[1], [0], [0], [1], [0, 0, 1, 1], [], []>} : vector<32x32xf32>, vector<32x32xf32>, vector<32x32xf32> -> vector<32x32xf32>
    %86 = vector.broadcast %18 : vector<1x32xf32> to vector<32x32xf32>
    %87 = arith.addf %85, %86 : vector<32x32xf32>
    %88 = arith.addf %13, %87 : vector<32x32xf32>
    %cst_27 = arith.constant dense<0.000000e+00> : vector<32xf32>
    %89 = vector.multi_reduction <add>, %88, %cst_27 [1] : vector<32x32xf32> to vector<32xf32>
    %90 = vector.shape_cast %89 : vector<32xf32> to vector<32x1xf32>
    %cst_28 = arith.constant 3.200000e+01 : f32
    %91 = vector.broadcast %cst_28 : f32 to vector<32x1xf32>
    %92 = arith.divf %90, %91 : vector<32x1xf32>
    %93 = vector.broadcast %92 : vector<32x1xf32> to vector<32x32xf32>
    %94 = arith.subf %88, %93 : vector<32x32xf32>
    %95 = arith.mulf %94, %94 : vector<32x32xf32>
    %cst_29 = arith.constant dense<0.000000e+00> : vector<32xf32>
    %96 = vector.multi_reduction <add>, %95, %cst_29 [1] : vector<32x32xf32> to vector<32xf32>
    %97 = vector.shape_cast %96 : vector<32xf32> to vector<32x1xf32>
    %cst_30 = arith.constant 3.200000e+01 : f32
    %98 = vector.broadcast %cst_30 : f32 to vector<32x1xf32>
    %99 = arith.divf %97, %98 : vector<32x1xf32>
    %100 = vector.broadcast %92 : vector<32x1xf32> to vector<32x32xf32>
    %101 = arith.subf %88, %100 : vector<32x32xf32>
    %cst_31 = arith.constant 9.99999974E-6 : f32
    %102 = vector.broadcast %cst_31 : f32 to vector<32x1xf32>
    %103 = arith.addf %99, %102 : vector<32x1xf32>
    %104 = math.rsqrt %103 : vector<32x1xf32>
    %105 = vector.broadcast %104 : vector<32x1xf32> to vector<32x32xf32>
    %106 = arith.mulf %101, %105 : vector<32x32xf32>
    %107 = vector.broadcast %23 : vector<1x32xf32> to vector<32x32xf32>
    %108 = arith.mulf %106, %107 : vector<32x32xf32>
    %109 = vector.broadcast %24 : vector<1x32xf32> to vector<32x32xf32>
    %110 = arith.addf %108, %109 : vector<32x32xf32>
    %cst_32 = arith.constant dense<0.000000e+00> : vector<32x128xf32>
    %111 = tpu.matmul %110, %19, %cst_32 {dimension_numbers = #tpu.dot_dimension_numbers<[1], [0], [0], [1], [0, 0, 1, 1], [], []>} : vector<32x32xf32>, vector<32x128xf32>, vector<32x128xf32> -> vector<32x128xf32>
    %112 = vector.broadcast %20 : vector<1x128xf32> to vector<32x128xf32>
    %113 = arith.addf %111, %112 : vector<32x128xf32>
    %114 = vector.extract_strided_slice %113 {offsets = [0, 0], sizes = [32, 64], strides = [1, 1]} : vector<32x128xf32> to vector<32x64xf32>
    %115 = vector.extract_strided_slice %113 {offsets = [0, 64], sizes = [32, 64], strides = [1, 1]} : vector<32x128xf32> to vector<32x64xf32>
    %cst_33 = arith.constant 0.000000e+00 : f32
    %116 = vector.broadcast %cst_33 : f32 to vector<32x64xf32>
    %117 = arith.maximumf %115, %116 : vector<32x64xf32>
    %118 = arith.mulf %114, %117 : vector<32x64xf32>
    %cst_34 = arith.constant dense<0.000000e+00> : vector<32x32xf32>
    %119 = tpu.matmul %118, %21, %cst_34 {dimension_numbers = #tpu.dot_dimension_numbers<[1], [0], [0], [1], [0, 0, 1, 1], [], []>} : vector<32x64xf32>, vector<64x32xf32>, vector<32x32xf32> -> vector<32x32xf32>
    %120 = vector.broadcast %22 : vector<1x32xf32> to vector<32x32xf32>
    %121 = arith.addf %119, %120 : vector<32x32xf32>
    %122 = arith.addf %88, %121 : vector<32x32xf32>
    %c376 = arith.constant 376 : index
    %c0_35 = arith.constant 0 : index
    %123 = vector.load %arg2[%c376, %c0_35] : memref<616x128xf32, #tpu.memory_space<vmem>>, vector<32x64xf32>
    %c408 = arith.constant 408 : index
    %c0_36 = arith.constant 0 : index
    %124 = vector.load %arg2[%c408, %c0_36] : memref<616x128xf32, #tpu.memory_space<vmem>>, vector<1x64xf32>
    %c416 = arith.constant 416 : index
    %c0_37 = arith.constant 0 : index
    %125 = vector.load %arg2[%c416, %c0_37] : memref<616x128xf32, #tpu.memory_space<vmem>>, vector<1x32xf32>
    %c456 = arith.constant 456 : index
    %c0_38 = arith.constant 0 : index
    %126 = vector.load %arg2[%c456, %c0_38] : memref<616x128xf32, #tpu.memory_space<vmem>>, vector<32x32xf32>
    %c488 = arith.constant 488 : index
    %c0_39 = arith.constant 0 : index
    %127 = vector.load %arg2[%c488, %c0_39] : memref<616x128xf32, #tpu.memory_space<vmem>>, vector<1x32xf32>
    %c496 = arith.constant 496 : index
    %c0_40 = arith.constant 0 : index
    %128 = vector.load %arg2[%c496, %c0_40] : memref<616x128xf32, #tpu.memory_space<vmem>>, vector<32x128xf32>
    %c528 = arith.constant 528 : index
    %c0_41 = arith.constant 0 : index
    %129 = vector.load %arg2[%c528, %c0_41] : memref<616x128xf32, #tpu.memory_space<vmem>>, vector<1x128xf32>
    %c536 = arith.constant 536 : index
    %c0_42 = arith.constant 0 : index
    %130 = vector.load %arg2[%c536, %c0_42] : memref<616x128xf32, #tpu.memory_space<vmem>>, vector<64x32xf32>
    %c600 = arith.constant 600 : index
    %c0_43 = arith.constant 0 : index
    %131 = vector.load %arg2[%c600, %c0_43] : memref<616x128xf32, #tpu.memory_space<vmem>>, vector<1x32xf32>
    %c440 = arith.constant 440 : index
    %c0_44 = arith.constant 0 : index
    %132 = vector.load %arg2[%c440, %c0_44] : memref<616x128xf32, #tpu.memory_space<vmem>>, vector<1x32xf32>
    %c448 = arith.constant 448 : index
    %c0_45 = arith.constant 0 : index
    %133 = vector.load %arg2[%c448, %c0_45] : memref<616x128xf32, #tpu.memory_space<vmem>>, vector<1x32xf32>
    %c608 = arith.constant 608 : index
    %c0_46 = arith.constant 0 : index
    %134 = vector.load %arg2[%c608, %c0_46] : memref<616x128xf32, #tpu.memory_space<vmem>>, vector<1x32xf32>
    %c424 = arith.constant 424 : index
    %c0_47 = arith.constant 0 : index
    %135 = vector.load %arg2[%c424, %c0_47] : memref<616x128xf32, #tpu.memory_space<vmem>>, vector<1x32xf32>
    %c432 = arith.constant 432 : index
    %c0_48 = arith.constant 0 : index
    %136 = vector.load %arg2[%c432, %c0_48] : memref<616x128xf32, #tpu.memory_space<vmem>>, vector<1x32xf32>
    %cst_49 = arith.constant dense<0.000000e+00> : vector<32xf32>
    %137 = vector.multi_reduction <add>, %122, %cst_49 [1] : vector<32x32xf32> to vector<32xf32>
    %138 = vector.shape_cast %137 : vector<32xf32> to vector<32x1xf32>
    %cst_50 = arith.constant 3.200000e+01 : f32
    %139 = vector.broadcast %cst_50 : f32 to vector<32x1xf32>
    %140 = arith.divf %138, %139 : vector<32x1xf32>
    %141 = vector.broadcast %140 : vector<32x1xf32> to vector<32x32xf32>
    %142 = arith.subf %122, %141 : vector<32x32xf32>
    %143 = arith.mulf %142, %142 : vector<32x32xf32>
    %cst_51 = arith.constant dense<0.000000e+00> : vector<32xf32>
    %144 = vector.multi_reduction <add>, %143, %cst_51 [1] : vector<32x32xf32> to vector<32xf32>
    %145 = vector.shape_cast %144 : vector<32xf32> to vector<32x1xf32>
    %cst_52 = arith.constant 3.200000e+01 : f32
    %146 = vector.broadcast %cst_52 : f32 to vector<32x1xf32>
    %147 = arith.divf %145, %146 : vector<32x1xf32>
    %148 = vector.broadcast %140 : vector<32x1xf32> to vector<32x32xf32>
    %149 = arith.subf %122, %148 : vector<32x32xf32>
    %cst_53 = arith.constant 9.99999974E-6 : f32
    %150 = vector.broadcast %cst_53 : f32 to vector<32x1xf32>
    %151 = arith.addf %147, %150 : vector<32x1xf32>
    %152 = math.rsqrt %151 : vector<32x1xf32>
    %153 = vector.broadcast %152 : vector<32x1xf32> to vector<32x32xf32>
    %154 = arith.mulf %149, %153 : vector<32x32xf32>
    %155 = vector.broadcast %135 : vector<1x32xf32> to vector<32x32xf32>
    %156 = arith.mulf %154, %155 : vector<32x32xf32>
    %157 = vector.broadcast %136 : vector<1x32xf32> to vector<32x32xf32>
    %158 = arith.addf %156, %157 : vector<32x32xf32>
    %cst_54 = arith.constant dense<0.000000e+00> : vector<32x64xf32>
    %159 = tpu.matmul %158, %123, %cst_54 {dimension_numbers = #tpu.dot_dimension_numbers<[1], [0], [0], [1], [0, 0, 1, 1], [], []>} : vector<32x32xf32>, vector<32x64xf32>, vector<32x64xf32> -> vector<32x64xf32>
    %160 = vector.broadcast %124 : vector<1x64xf32> to vector<32x64xf32>
    %161 = arith.addf %159, %160 : vector<32x64xf32>
    %162 = vector.extract_strided_slice %161 {offsets = [0, 0], sizes = [32, 32], strides = [1, 1]} : vector<32x64xf32> to vector<32x32xf32>
    %163 = vector.shape_cast %162 : vector<32x32xf32> to vector<4x8x32xf32>
    %164 = vector.extract_strided_slice %161 {offsets = [0, 32], sizes = [32, 32], strides = [1, 1]} : vector<32x64xf32> to vector<32x32xf32>
    %165 = vector.shape_cast %164 : vector<32x32xf32> to vector<4x8x32xf32>
    %166 = vector.extract_strided_slice %163 {offsets = [0, 0, 0], sizes = [4, 1, 32], strides = [1, 1, 1]} : vector<4x8x32xf32> to vector<4x1x32xf32>
    %167 = vector.shape_cast %125 : vector<1x32xf32> to vector<1x1x32xf32>
    %168 = vector.broadcast %167 : vector<1x1x32xf32> to vector<4x1x32xf32>
    %169 = arith.mulf %166, %168 : vector<4x1x32xf32>
    %170 = vector.shape_cast %163 : vector<4x8x32xf32> to vector<4x1x8x32xf32>
    %171 = vector.shape_cast %170 : vector<4x1x8x32xf32> to vector<4x1x8x32xf32>
    %172 = vector.broadcast %171 : vector<4x1x8x32xf32> to vector<4x4x8x32xf32>
    %173 = vector.shape_cast %172 : vector<4x4x8x32xf32> to vector<4x32x32xf32>
    %174 = vector.shape_cast %0 : vector<32x32xf32> to vector<1x32x32xf32>
    %175 = vector.broadcast %174 : vector<1x32x32xf32> to vector<4x32x32xf32>
    %176 = arith.mulf %173, %175 : vector<4x32x32xf32>
    %177 = vector.shape_cast %165 : vector<4x8x32xf32> to vector<4x1x8x32xf32>
    %178 = vector.shape_cast %177 : vector<4x1x8x32xf32> to vector<4x1x8x32xf32>
    %179 = vector.broadcast %178 : vector<4x1x8x32xf32> to vector<4x4x8x32xf32>
    %180 = vector.shape_cast %179 : vector<4x4x8x32xf32> to vector<4x32x32xf32>
    %181 = vector.shape_cast %0 : vector<32x32xf32> to vector<1x32x32xf32>
    %182 = vector.broadcast %181 : vector<1x32x32xf32> to vector<4x32x32xf32>
    %183 = arith.mulf %180, %182 : vector<4x32x32xf32>
    "tpu.trace_start"() <{level = 10 : i32, message = "bid,bkd->bik"}> : () -> ()
    %cst_55 = arith.constant dense<0.000000e+00> : vector<4x1x32xf32>
    %184 = tpu.matmul %169, %176, %cst_55 {dimension_numbers = #tpu.dot_dimension_numbers<[2], [2], [1], [1], [0, 0, 0, 1, 1, 1], [0], [0]>} : vector<4x1x32xf32>, vector<4x32x32xf32>, vector<4x1x32xf32> -> vector<4x1x32xf32>
    "tpu.trace_stop"() : () -> ()
    %cst_56 = arith.constant 0.353553385 : f32
    %185 = vector.broadcast %cst_56 : f32 to vector<4x1x32xf32>
    %186 = arith.mulf %184, %185 : vector<4x1x32xf32>
    %187 = vector.shape_cast %134 : vector<1x32xf32> to vector<1x1x32xf32>
    %188 = vector.broadcast %187 : vector<1x1x32xf32> to vector<4x1x32xf32>
    %189 = arith.addf %186, %188 : vector<4x1x32xf32>
    %190 = vector.extract_strided_slice %189 {offsets = [0, 0, 0], sizes = [4, 1, 8], strides = [1, 1, 1]} : vector<4x1x32xf32> to vector<4x1x8xf32>
    %cst_57 = arith.constant dense<0xFF800000> : vector<4x1xf32>
    %191 = vector.multi_reduction <maximumf>, %190, %cst_57 [2] : vector<4x1x8xf32> to vector<4x1xf32>
    %192 = vector.shape_cast %191 : vector<4x1xf32> to vector<4x1x1xf32>
    %193 = vector.broadcast %192 : vector<4x1x1xf32> to vector<4x1x8xf32>
    %194 = arith.subf %190, %193 : vector<4x1x8xf32>
    %195 = vector.extract_strided_slice %189 {offsets = [0, 0, 8], sizes = [4, 1, 8], strides = [1, 1, 1]} : vector<4x1x32xf32> to vector<4x1x8xf32>
    %cst_58 = arith.constant dense<0xFF800000> : vector<4x1xf32>
    %196 = vector.multi_reduction <maximumf>, %195, %cst_58 [2] : vector<4x1x8xf32> to vector<4x1xf32>
    %197 = vector.shape_cast %196 : vector<4x1xf32> to vector<4x1x1xf32>
    %198 = vector.broadcast %197 : vector<4x1x1xf32> to vector<4x1x8xf32>
    %199 = arith.subf %195, %198 : vector<4x1x8xf32>
    %200 = vector.extract_strided_slice %189 {offsets = [0, 0, 16], sizes = [4, 1, 8], strides = [1, 1, 1]} : vector<4x1x32xf32> to vector<4x1x8xf32>
    %cst_59 = arith.constant dense<0xFF800000> : vector<4x1xf32>
    %201 = vector.multi_reduction <maximumf>, %200, %cst_59 [2] : vector<4x1x8xf32> to vector<4x1xf32>
    %202 = vector.shape_cast %201 : vector<4x1xf32> to vector<4x1x1xf32>
    %203 = vector.broadcast %202 : vector<4x1x1xf32> to vector<4x1x8xf32>
    %204 = arith.subf %200, %203 : vector<4x1x8xf32>
    %205 = vector.extract_strided_slice %189 {offsets = [0, 0, 24], sizes = [4, 1, 8], strides = [1, 1, 1]} : vector<4x1x32xf32> to vector<4x1x8xf32>
    %cst_60 = arith.constant dense<0xFF800000> : vector<4x1xf32>
    %206 = vector.multi_reduction <maximumf>, %205, %cst_60 [2] : vector<4x1x8xf32> to vector<4x1xf32>
    %207 = vector.shape_cast %206 : vector<4x1xf32> to vector<4x1x1xf32>
    %208 = vector.broadcast %207 : vector<4x1x1xf32> to vector<4x1x8xf32>
    %209 = arith.subf %205, %208 : vector<4x1x8xf32>
    %210 = tpu.concatenate %194, %199, %204, %209 in 2 : vector<4x1x8xf32>, vector<4x1x8xf32>, vector<4x1x8xf32>, vector<4x1x8xf32> -> vector<4x1x32xf32>
    %211 = math.exp %210 : vector<4x1x32xf32>
    %212 = vector.shape_cast %211 : vector<4x1x32xf32> to vector<4x32xf32>
    %cst_61 = arith.constant dense<0.000000e+00> : vector<4x32xf32>
    %213 = tpu.matmul %212, %1, %cst_61 {dimension_numbers = #tpu.dot_dimension_numbers<[1], [0], [0], [1], [0, 0, 1, 1], [], []>} : vector<4x32xf32>, vector<32x32xf32>, vector<4x32xf32> -> vector<4x32xf32>
    %214 = vector.shape_cast %213 : vector<4x32xf32> to vector<4x1x32xf32>
    %215 = tpu.reciprocal %214 {approx = true} : vector<4x1x32xf32> -> vector<4x1x32xf32>
    %216 = arith.mulf %211, %215 : vector<4x1x32xf32>
    "tpu.trace_start"() <{level = 10 : i32, message = "bik,bkd->bid"}> : () -> ()
    %cst_62 = arith.constant dense<0.000000e+00> : vector<4x1x32xf32>
    %217 = tpu.matmul %216, %183, %cst_62 {dimension_numbers = #tpu.dot_dimension_numbers<[2], [1], [1], [2], [0, 0, 0, 1, 1, 2], [0], [0]>} : vector<4x1x32xf32>, vector<4x32x32xf32>, vector<4x1x32xf32> -> vector<4x1x32xf32>
    "tpu.trace_stop"() : () -> ()
    %218 = vector.shape_cast %217 : vector<4x1x32xf32> to vector<4x32xf32>
    %cst_63 = arith.constant dense<0.000000e+00> : vector<4x32xf32>
    %219 = tpu.matmul %218, %126, %cst_63 {dimension_numbers = #tpu.dot_dimension_numbers<[1], [0], [0], [1], [0, 0, 1, 1], [], []>} : vector<4x32xf32>, vector<32x32xf32>, vector<4x32xf32> -> vector<4x32xf32>
    %220 = vector.broadcast %127 : vector<1x32xf32> to vector<4x32xf32>
    %221 = arith.addf %219, %220 : vector<4x32xf32>
    %222 = vector.shape_cast %122 : vector<32x32xf32> to vector<4x8x32xf32>
    %223 = vector.extract_strided_slice %222 {offsets = [0, 0, 0], sizes = [4, 1, 32], strides = [1, 1, 1]} : vector<4x8x32xf32> to vector<4x1x32xf32>
    %224 = vector.shape_cast %223 : vector<4x1x32xf32> to vector<4x32xf32>
    %225 = arith.addf %224, %221 : vector<4x32xf32>
    %cst_64 = arith.constant dense<0.000000e+00> : vector<4xf32>
    %226 = vector.multi_reduction <add>, %225, %cst_64 [1] : vector<4x32xf32> to vector<4xf32>
    %227 = vector.shape_cast %226 : vector<4xf32> to vector<4x1xf32>
    %cst_65 = arith.constant 3.200000e+01 : f32
    %228 = vector.broadcast %cst_65 : f32 to vector<4x1xf32>
    %229 = arith.divf %227, %228 : vector<4x1xf32>
    %230 = vector.broadcast %229 : vector<4x1xf32> to vector<4x32xf32>
    %231 = arith.subf %225, %230 : vector<4x32xf32>
    %232 = arith.mulf %231, %231 : vector<4x32xf32>
    %cst_66 = arith.constant dense<0.000000e+00> : vector<4xf32>
    %233 = vector.multi_reduction <add>, %232, %cst_66 [1] : vector<4x32xf32> to vector<4xf32>
    %234 = vector.shape_cast %233 : vector<4xf32> to vector<4x1xf32>
    %cst_67 = arith.constant 3.200000e+01 : f32
    %235 = vector.broadcast %cst_67 : f32 to vector<4x1xf32>
    %236 = arith.divf %234, %235 : vector<4x1xf32>
    %237 = vector.broadcast %229 : vector<4x1xf32> to vector<4x32xf32>
    %238 = arith.subf %225, %237 : vector<4x32xf32>
    %cst_68 = arith.constant 9.99999974E-6 : f32
    %239 = vector.broadcast %cst_68 : f32 to vector<4x1xf32>
    %240 = arith.addf %236, %239 : vector<4x1xf32>
    %241 = math.rsqrt %240 : vector<4x1xf32>
    %242 = vector.broadcast %241 : vector<4x1xf32> to vector<4x32xf32>
    %243 = arith.mulf %238, %242 : vector<4x32xf32>
    %244 = vector.broadcast %132 : vector<1x32xf32> to vector<4x32xf32>
    %245 = arith.mulf %243, %244 : vector<4x32xf32>
    %246 = vector.broadcast %133 : vector<1x32xf32> to vector<4x32xf32>
    %247 = arith.addf %245, %246 : vector<4x32xf32>
    %cst_69 = arith.constant dense<0.000000e+00> : vector<4x128xf32>
    %248 = tpu.matmul %247, %128, %cst_69 {dimension_numbers = #tpu.dot_dimension_numbers<[1], [0], [0], [1], [0, 0, 1, 1], [], []>} : vector<4x32xf32>, vector<32x128xf32>, vector<4x128xf32> -> vector<4x128xf32>
    %249 = vector.broadcast %129 : vector<1x128xf32> to vector<4x128xf32>
    %250 = arith.addf %248, %249 : vector<4x128xf32>
    %251 = vector.extract_strided_slice %250 {offsets = [0, 0], sizes = [4, 64], strides = [1, 1]} : vector<4x128xf32> to vector<4x64xf32>
    %252 = vector.extract_strided_slice %250 {offsets = [0, 64], sizes = [4, 64], strides = [1, 1]} : vector<4x128xf32> to vector<4x64xf32>
    %cst_70 = arith.constant 0.000000e+00 : f32
    %253 = vector.broadcast %cst_70 : f32 to vector<4x64xf32>
    %254 = arith.maximumf %252, %253 : vector<4x64xf32>
    %255 = arith.mulf %251, %254 : vector<4x64xf32>
    %cst_71 = arith.constant dense<0.000000e+00> : vector<4x32xf32>
    %256 = tpu.matmul %255, %130, %cst_71 {dimension_numbers = #tpu.dot_dimension_numbers<[1], [0], [0], [1], [0, 0, 1, 1], [], []>} : vector<4x64xf32>, vector<64x32xf32>, vector<4x32xf32> -> vector<4x32xf32>
    %257 = vector.broadcast %131 : vector<1x32xf32> to vector<4x32xf32>
    %258 = arith.addf %256, %257 : vector<4x32xf32>
    %259 = arith.addf %225, %258 : vector<4x32xf32>
    %c80 = arith.constant 80 : index
    %c0_72 = arith.constant 0 : index
    %260 = vector.load %arg2[%c80, %c0_72] : memref<616x128xf32, #tpu.memory_space<vmem>>, vector<1x32xf32>
    %c88 = arith.constant 88 : index
    %c0_73 = arith.constant 0 : index
    %261 = vector.load %arg2[%c88, %c0_73] : memref<616x128xf32, #tpu.memory_space<vmem>>, vector<1x32xf32>
    %c96 = arith.constant 96 : index
    %c0_74 = arith.constant 0 : index
    %262 = vector.load %arg2[%c96, %c0_74] : memref<616x128xf32, #tpu.memory_space<vmem>>, vector<32x128xf32>
    %c128 = arith.constant 128 : index
    %c0_75 = arith.constant 0 : index
    %263 = vector.load %arg2[%c128, %c0_75] : memref<616x128xf32, #tpu.memory_space<vmem>>, vector<1x128xf32>
    %cst_76 = arith.constant dense<0.000000e+00> : vector<4xf32>
    %264 = vector.multi_reduction <add>, %259, %cst_76 [1] : vector<4x32xf32> to vector<4xf32>
    %265 = vector.shape_cast %264 : vector<4xf32> to vector<4x1xf32>
    %cst_77 = arith.constant 3.200000e+01 : f32
    %266 = vector.broadcast %cst_77 : f32 to vector<4x1xf32>
    %267 = arith.divf %265, %266 : vector<4x1xf32>
    %268 = vector.broadcast %267 : vector<4x1xf32> to vector<4x32xf32>
    %269 = arith.subf %259, %268 : vector<4x32xf32>
    %270 = arith.mulf %269, %269 : vector<4x32xf32>
    %cst_78 = arith.constant dense<0.000000e+00> : vector<4xf32>
    %271 = vector.multi_reduction <add>, %270, %cst_78 [1] : vector<4x32xf32> to vector<4xf32>
    %272 = vector.shape_cast %271 : vector<4xf32> to vector<4x1xf32>
    %cst_79 = arith.constant 3.200000e+01 : f32
    %273 = vector.broadcast %cst_79 : f32 to vector<4x1xf32>
    %274 = arith.divf %272, %273 : vector<4x1xf32>
    %275 = vector.broadcast %267 : vector<4x1xf32> to vector<4x32xf32>
    %276 = arith.subf %259, %275 : vector<4x32xf32>
    %cst_80 = arith.constant 9.99999974E-6 : f32
    %277 = vector.broadcast %cst_80 : f32 to vector<4x1xf32>
    %278 = arith.addf %274, %277 : vector<4x1xf32>
    %279 = math.rsqrt %278 : vector<4x1xf32>
    %280 = vector.broadcast %279 : vector<4x1xf32> to vector<4x32xf32>
    %281 = arith.mulf %276, %280 : vector<4x32xf32>
    %282 = vector.broadcast %260 : vector<1x32xf32> to vector<4x32xf32>
    %283 = arith.mulf %281, %282 : vector<4x32xf32>
    %284 = vector.broadcast %261 : vector<1x32xf32> to vector<4x32xf32>
    %285 = arith.addf %283, %284 : vector<4x32xf32>
    %cst_81 = arith.constant 0.000000e+00 : f32
    %286 = vector.broadcast %cst_81 : f32 to vector<4x32xf32>
    %287 = arith.maximumf %285, %286 : vector<4x32xf32>
    %cst_82 = arith.constant dense<0.000000e+00> : vector<4x128xf32>
    %288 = tpu.matmul %287, %262, %cst_82 {dimension_numbers = #tpu.dot_dimension_numbers<[1], [0], [0], [1], [0, 0, 1, 1], [], []>} : vector<4x32xf32>, vector<32x128xf32>, vector<4x128xf32> -> vector<4x128xf32>
    %289 = vector.broadcast %263 : vector<1x128xf32> to vector<4x128xf32>
    %290 = arith.addf %288, %289 : vector<4x128xf32>
    %c0_83 = arith.constant 0 : index
    %c0_84 = arith.constant 0 : index
    %291 = vector.load %arg3[%c0_83, %c0_84] : memref<4x128xf32, #tpu.memory_space<vmem>>, vector<4x128xf32>
    tpu.vector_store %arg3[%c0_83, %c0_84], %290 {strides = array<i32>} : memref<4x128xf32, #tpu.memory_space<vmem>>, vector<4x128xf32>,
    return
  }
  func.func @transform_0(%arg0: i32) -> (i32, i32) {
    %c0_i32 = arith.constant 0 : i32
    %c0_i32_0 = arith.constant 0 : i32
    %c0_i32_1 = arith.constant 0 : i32
    return %c0_i32, %c0_i32_0 : i32, i32
  }
  func.func @transform_1(%arg0: i32) -> (i32, i32) {
    %c0_i32 = arith.constant 0 : i32
    %c0_i32_0 = arith.constant 0 : i32
    %c0_i32_1 = arith.constant 0 : i32
    return %c0_i32, %c0_i32_0 : i32, i32
  }
  func.func @transform_2(%arg0: i32) -> (i32, i32) {
    %c0_i32 = arith.constant 0 : i32
    %c0_i32_0 = arith.constant 0 : i32
    %c0_i32_1 = arith.constant 0 : i32
    return %c0_i32, %c0_i32_0 : i32, i32
  }
}

</mosaic_0001>

<bundles_post_ra>
// kernel: forward.1
= control target key start
LH: loop header
LB: loop body
LE: loop exit
PB: predicated region body
PF: predicated region fallthrough
CT: control target
= control target key end

     0   :  { %7 = vsyncpa [#allocation3], 0  ;;  %s2154_s12 = smov [#allocation2]   ;;  %s2155_s14 = smov 128   ;;  %s2803_s0 = inlined_call_operand.vmem [shape: f32[4,8], index: 0, kind: input, shape index: {}]   ;;  %s2804_s1 = inlined_call_operand.hbm [shape: f32[616,128], index: 1, kind: input, shape index: {}]   ;;  %s2805_s2 = inlined_call_operand.vmem [shape: f32[4,128], index: 2, kind: output, shape index: {}]  }
   0x1   :  { %s14_s11 = sshll.u32 %s2804_s1, 4  ;;  %s16_s13 = sshll.u32 %s2154_s12, 4  ;;  %s15_s11 = int_to_ptr.hbm [resolvable:$true] %s14_s11  ;;  %s17_s13 = int_to_ptr.vmem [resolvable:$true] %s16_s13 }
   0x2   :  { %s2156_s15 = smov 8  }
   0x3   :  { %22 = dma.hbm_to_vmem [thread:$0]  %s15_s11, 9856, %s17_s13, [#allocation3], %s2155_s14, %s2155_s14, %s2156_s15  }
   0x4   :  { %2152 = dma.done.wait [#allocation3], 9856  }
   0x5   :  { %2153 = vsyncadd [#allocation3], 4294957440  ;;  %v39_v0 = vlaneseq  ;;  %v35_v2 = vld [vmem:[%s2803_s0] sm:$0xf]  ;;  %v76_v4 = vld [vmem:[#allocation2 + $0x98] sm:$0xff]  ;;  %vm103_vm0 = vcmask 261120  }
   0x6   :  { %v77_v3 = vld [vmem:[#allocation2 + $0xa0] sm:$0xff]  ;;  %v38_v5 = vperm.slane %v35_v2, 0  ;;  %v52_v6 = vperm.slane %v35_v2, 2  ;;  %v45_v7 = vperm.slane %v35_v2, 1  ;;  %v59_v8 = vperm.slane %v35_v2, 3  ;;  %v75_v9 = vld [vmem:[#allocation2 + $0x90] sm:$0xff] }
   0x7   :  { %v40_v1 = vshrl.u32 %v39_v0, 7  ;;  %128 = vmatpush.msra.mxu0 %v77_v3  ;;  %v74_v10 = vld [vmem:[#allocation2 + $0x88] sm:$0xff]  ;;  %v36_v11 = vld [vmem:[#allocation2] sm:$0xff]  ;;  %v2209_v33 = vld [vmem:[#allocation2 + $0x18] sm:$0xff]  ;;  %vm397_vm1 = vcmask 261312   ;;  %vm380_vm2 = vcmask 195712  }
   0x8   :  { %v37_v12 = vld [vmem:[#allocation2 + $0x8] sm:$0xff]  ;;  %v2204_v30 = vld [vmem:[#allocation2 + $0x20] sm:$0xff]  ;;  %v2218_v37 = vld [vmem:[#allocation2 + $0x10] sm:$0xff]  ;;  %vm346_vm3 = vcmask 64512   ;;  %vm363_vm4 = vcmask 130112   ;;  %s2157_s0 = smov 32  }
   0x9   :  { %1966 = vset.pattern.permute.xlu0 %v40_v1  ;;  %1967 = vset.pattern.permute.xlu1 %v40_v1  ;;  %v2048_v25 = vld [vmem:[#allocation2 + $0xa8] ss:$0 sm:$0xff]  ;;  %v2049_v38 = vld [vmem:[#allocation2 + $0xb0] ss:$0 sm:$0xff]  ;;  %vm418_vm5 = vcmask 130048   ;;  %vm423_vm6 = vcmask 195584  }
   0xa   :  { %129 = vmatpush.msra.mxu0 %v76_v4  ;;  %v2198_v27 = vld [vmem:[#allocation2 + $0x28] sm:$0xff]  ;;  %v101_v59 = vld [vmem:[#allocation2 + $0x170] sm:$0xff]  ;;  %s2158_s1 = smov 96   ;;  %s2160_s18 = smov 64  }
   0xc   :  { %130 = vmatpush.msra.mxu0 %v75_v9 }
   0xe   :  { %131 = vmatpush.msra.mxu0 %v74_v10 }
  0x11   :  { %43 = vperm.xlu0 %1966, %v38_v5   ;;  %57 = vperm.xlu1 %1967, %v52_v6  }
  0x19   :  { %50 = vperm.xlu0 %1966, %v45_v7   ;;  %64 = vperm.xlu1 %1967, %v59_v8  }
  0x83   :  { %v44_v13 = vpop.permute.xlu0 %43  ;;  %v58_v17 = vpop.permute.xlu1 %57 }
  0x84   :  { %v66_v14 = vmul.f32 %v44_v13, %v36_v11  ;;  %v68_v20 = vmul.f32 %v58_v17, %v36_v11 }
  0x86   :  { %v2182_v15 = vadd.f32 %v66_v14, %v37_v12  ;;  %v2190_v21 = vadd.f32 %v68_v20, %v37_v12 }
  0x88   :  { %1882 = vmatmul.msk.f32.vlgmr.msra.gmra.mxu0 %vm103_vm0, %v2182_v15 }
  0x8b   :  { %v51_v16 = vpop.permute.xlu0 %50  ;;  %v65_v22 = vpop.permute.xlu1 %64 }
  0x8c   :  { %v67_v18 = vmul.f32 %v51_v16, %v36_v11  ;;  %v69_v23 = vmul.f32 %v65_v22, %v36_v11 }
  0x8e   :  { %v2186_v19 = vadd.f32 %v67_v18, %v37_v12  ;;  %v2194_v24 = vadd.f32 %v69_v23, %v37_v12 }
  0x90   :  { %1883 = vmatmul.msk.f32.gmra.mxu0 %vm103_vm0, %v2186_v19 }
  0x98   :  { %1884 = vmatmul.msk.f32.gmra.mxu0 %vm103_vm0, %v2190_v21 }
  0xa0   :  { %1885 = vmatmul.msk.f32.gmra.mxu0 %vm103_vm0, %v2194_v24 }
 0x105   :  { %v133_v26 = vpop.f32.mrf.mxu0 }
 0x106   :  { %v2200_v28 = vadd.f32 %v2048_v25, %v133_v26 }
 0x108   :  { %v153_v29 = vmul.f32 %v2200_v28, %v2198_v27  ;;  %v152_v31 = vmul.f32 %v2200_v28, %v2204_v30  ;;  %v151_v35 = vmul.f32 %v2200_v28, %v2209_v33  ;;  %v150_v39 = vmul.f32 %v2200_v28, %v2218_v37 }
 0x109   :  { %v146_v43 = vmul.f32 %v2049_v38, %v2200_v28 }
 0x10a   :  { %1886 = vmatpush.xpose.msk.msra.mxu1 %vm103_vm0, %v153_v29 }
 0x10d   :  { %v136_v32 = vpop.f32.mrf.mxu0 }
 0x10e   :  { %v2211_v34 = vadd.f32 %v2048_v25, %v136_v32  ;;  %1887 = vmatpush.xpose.msk.msra.mxu1 %vm103_vm0, %v152_v31  ;;  %v34_v31 = vld [vmem:[#allocation2 + $0x48] sm:$0xff]  ;;  %v31_v32 = vld [vmem:[#allocation2 + $0x30] sm:$0xff] }
 0x110   :  { %v157_v36 = vmul.f32 %v2211_v34, %v2198_v27  ;;  %v156_v40 = vmul.f32 %v2211_v34, %v2204_v30  ;;  %v155_v44 = vmul.f32 %v2211_v34, %v2209_v33  ;;  %v154_v47 = vmul.f32 %v2211_v34, %v2218_v37 }
 0x111   :  { %v147_v51 = vmul.f32 %v2049_v38, %v2211_v34 }
 0x112   :  { %1888 = vmatpush.xpose.msk.msra.mxu1 %vm103_vm0, %v151_v35  ;;  %1891 = vmatpush.xpose.msk.msra.mxu2 %vm103_vm0, %v157_v36 }
 0x115   :  { %v139_v41 = vpop.f32.mrf.mxu0 }
 0x116   :  { %v2226_v42 = vadd.f32 %v2048_v25, %v139_v41  ;;  %1889 = vmatpush.xpose.msk.msra.mxu1 %vm103_vm0, %v150_v39  ;;  %1892 = vmatpush.xpose.msk.msra.mxu2 %vm103_vm0, %v156_v40 }
 0x118   :  { %v161_v45 = vmul.f32 %v2226_v42, %v2198_v27  ;;  %v160_v46 = vmul.f32 %v2226_v42, %v2204_v30  ;;  %v159_v50 = vmul.f32 %v2226_v42, %v2209_v33  ;;  %v158_v53 = vmul.f32 %v2226_v42, %v2218_v37 }
 0x119   :  { %1890 = vmatmul.msk.f32.vlgmr.msra.gmra.mxu1 %vm103_vm0, %v146_v43  ;;  %v148_v55 = vmul.f32 %v2049_v38, %v2226_v42 }
 0x11a   :  { %1893 = vmatpush.xpose.msk.msra.mxu2 %vm103_vm0, %v155_v44  ;;  %1896 = vmatpush.xpose.msk.msra.mxu3 %vm103_vm0, %v161_v45 }
 0x11d   :  { %v142_v48 = vpop.f32.mrf.mxu0 }
 0x11e   :  { %v2242_v49 = vadd.f32 %v2048_v25, %v142_v48  ;;  %1894 = vmatpush.xpose.msk.msra.mxu2 %vm103_vm0, %v154_v47  ;;  %1897 = vmatpush.xpose.msk.msra.mxu3 %vm103_vm0, %v160_v46 }
 0x120   :  { %v165_v52 = vmul.f32 %v2242_v49, %v2198_v27  ;;  %v164_v54 = vmul.f32 %v2242_v49, %v2204_v30  ;;  %v163_v56 = vmul.f32 %v2242_v49, %v2209_v33  ;;  %v162_v57 = vmul.f32 %v2242_v49, %v2218_v37 }
 0x121   :  { %1895 = vmatmul.msk.f32.vlgmr.msra.gmra.mxu2 %vm103_vm0, %v147_v51  ;;  %v149_v58 = vmul.f32 %v2049_v38, %v2242_v49 }
 0x122   :  { %1898 = vmatpush.xpose.msk.msra.mxu3 %vm103_vm0, %v159_v50  ;;  %1901 = vmatpush.xpose.msk.msrb.mxu1 %vm103_vm0, %v165_v52 }
 0x123   :  { %460 = vmatpush.msrb.mxu2 %v34_v31 }
 0x126   :  { %1899 = vmatpush.xpose.msk.msra.mxu3 %vm103_vm0, %v158_v53  ;;  %1902 = vmatpush.xpose.msk.msrb.mxu1 %vm103_vm0, %v164_v54 }
 0x129   :  { %1900 = vmatmul.msk.f32.vlgmr.msra.gmra.mxu3 %vm103_vm0, %v148_v55 }
 0x12a   :  { %1903 = vmatpush.xpose.msk.msrb.mxu1 %vm103_vm0, %v163_v56 }
 0x12e   :  { %1904 = vmatpush.xpose.msk.msrb.mxu1 %vm103_vm0, %v162_v57 }
 0x131   :  { %1905 = vmatmul.msk.f32.vlgmr.msrb.gmra.mxu1 %vm103_vm0, %v149_v58 }
 0x196   :  { %v230_v60 = vpop.f32.mrf.mxu1 }
 0x197   :  { %v338_v61 = vmul.f32 0.35355338, %v230_v60 }
 0x199   :  { %v2270_v62 = vadd.f32 %v338_v61, %v101_v59 }
 0x19b   :  { %v398_v63 = vsel %vm397_vm1, %v2270_v62, -inf  ;;  %v381_v0 = vsel %vm380_vm2, %v2270_v62, -inf  ;;  %v347_v1 = vsel %vm346_vm3, %v2270_v62, -inf  ;;  %v364_v3 = vsel %vm363_vm4, %v2270_v62, -inf }
 0x19c   :  { %399 = vmax.xlane.f32.xlu1 %v398_v63  ;;  %382 = vmax.xlane.f32.xlu0 %v381_v0 }
 0x19d   :  { %348 = vmax.xlane.f32.xlu2 %v347_v1 }
 0x1a4   :  { %v265_v2 = vpop.f32.mrf.mxu2 }
 0x1a5   :  { %v339_v4 = vmul.f32 0.35355338, %v265_v2  ;;  %365 = vmax.xlane.f32.xlu2 %v364_v3 }
 0x1a7   :  { %v2280_v5 = vadd.f32 %v339_v4, %v101_v59 }
 0x1a9   :  { %v350_v7 = vsel %vm346_vm3, %v2280_v5, -inf  ;;  %v367_v14 = vsel %vm363_vm4, %v2280_v5, -inf  ;;  %v384_v20 = vsel %vm380_vm2, %v2280_v5, -inf  ;;  %v401_v22 = vsel %vm397_vm1, %v2280_v5, -inf }
 0x1ac   :  { %v300_v6 = vpop.f32.mrf.mxu3 }
 0x1ad   :  { %v340_v8 = vmul.f32 0.35355338, %v300_v6  ;;  %351 = vmax.xlane.f32.xlu2 %v350_v7 }
 0x1ae   :  { %v335_v9 = vpop.f32.mrf.mxu1 }
 0x1af   :  { %v2284_v10 = vadd.f32 %v340_v8, %v101_v59  ;;  %v341_v11 = vmul.f32 0.35355338, %v335_v9 }
 0x1b1   :  { %v404_v12 = vsel %vm397_vm1, %v2284_v10, -inf  ;;  %v387_v13 = vsel %vm380_vm2, %v2284_v10, -inf  ;;  %v2292_v16 = vadd.f32 %v341_v11, %v101_v59  ;;  %v353_v23 = vsel %vm346_vm3, %v2284_v10, -inf }
 0x1b2   :  { %405 = vmax.xlane.f32.xlu1 %v404_v12  ;;  %388 = vmax.xlane.f32.xlu0 %v387_v13  ;;  %v370_v25 = vsel %vm363_vm4, %v2284_v10, -inf }
 0x1b3   :  { %v390_v17 = vsel %vm380_vm2, %v2292_v16, -inf  ;;  %v373_v18 = vsel %vm363_vm4, %v2292_v16, -inf  ;;  %v356_v26 = vsel %vm346_vm3, %v2292_v16, -inf  ;;  %v407_v29 = vsel %vm397_vm1, %v2292_v16, -inf }
 0x1b5   :  { %368 = vmax.xlane.f32.xlu2 %v367_v14 }
 0x1ba   :  { %391 = vmax.xlane.f32.xlu1 %v390_v17  ;;  %374 = vmax.xlane.f32.xlu0 %v373_v18 }
 0x1bd   :  { %385 = vmax.xlane.f32.xlu2 %v384_v20 }
 0x1c5   :  { %402 = vmax.xlane.f32.xlu2 %v401_v22 }
 0x1cd   :  { %354 = vmax.xlane.f32.xlu2 %v353_v23 }
 0x1ce   :  { %176 = vrot.lane.b32.xlu0 %v2198_v27, %s2157_s0  ;;  %v33_v27 = vld [vmem:[#allocation2 + $0x40] sm:$0xff] }
 0x1cf   :  { %461 = vmatpush.msrb.mxu2 %v33_v27 }
 0x1d3   :  { %174 = vrot.lane.b32.xlu1 %v2204_v30, %s2157_s0  ;;  %v32_v30 = vld [vmem:[#allocation2 + $0x38] sm:$0xff] }
 0x1d4   :  { %462 = vmatpush.msrb.mxu2 %v32_v30 }
 0x1d5   :  { %371 = vmax.xlane.f32.xlu2 %v370_v25 }
 0x1d6   :  { %170 = vrot.lane.b32.xlu0 %v2218_v37, %s2157_s0  ;;  %463 = vmatpush.msrb.mxu2 %v31_v32 }
 0x1dd   :  { %357 = vmax.xlane.f32.xlu2 %v356_v26 }
 0x1e5   :  { %408 = vmax.xlane.f32.xlu2 %v407_v29 }
 0x1fd   :  { %172 = vrot.lane.b32.xlu2 %v2209_v33, %s2157_s0 }
 0x20f   :  { %v383_v36 = vpop.xlane.xlu0 %382  ;;  %v400_v37 = vpop.xlane.xlu1 %399 }
 0x210   :  { %v349_v35 = vpop.xlane.xlu2 %348  ;;  %v393_v41 = vsub.f32 %v2270_v62, %v383_v36  ;;  %v410_v33 = vsub.f32 %v2270_v62, %v400_v37 }
 0x211   :  { %v359_v39 = vsub.f32 %v2270_v62, %v349_v35 }
 0x218   :  { %v366_v38 = vpop.xlane.xlu2 %365 }
 0x219   :  { %v376_v40 = vsub.f32 %v2270_v62, %v366_v38 }
 0x21b   :  { %v414_v43 = vsel %vm346_vm3, %v359_v39, %v376_v40 }
 0x21c   :  { %v419_v44 = vsel %vm418_vm5, %v414_v43, %v393_v41 }
 0x21d   :  { %v424_v45 = vsel %vm423_vm6, %v419_v44, %v410_v33 }
 0x21e   :  { %v428_v46 = vmul.f32 1.442695, %v424_v45 }
 0x220   :  { %2066 = vpow2.f32 %v428_v46  ;;  %v352_v47 = vpop.xlane.xlu2 %351 }
 0x221   :  { %v360_v56 = vsub.f32 %v2280_v5, %v352_v47 }
 0x225   :  { %v389_v52 = vpop.xlane.xlu0 %388  ;;  %v406_v53 = vpop.xlane.xlu1 %405 }
 0x226   :  { %v2321_v48 = vpop.eup %2066  ;;  %v395_v17 = vsub.f32 %v2284_v10, %v389_v52  ;;  %v412_v18 = vsub.f32 %v2284_v10, %v406_v53 }
 0x227   :  { %1906 = vmatmul.msk.f32.vlgmr.msrb.gmra.mxu2 %vm103_vm0, %v2321_v48 }
 0x228   :  { %v369_v50 = vpop.xlane.xlu2 %368 }
 0x229   :  { %v377_v54 = vsub.f32 %v2280_v5, %v369_v50 }
 0x22b   :  { %v415_v58 = vsel %vm346_vm3, %v360_v56, %v377_v54 }
 0x22d   :  { %v375_v61 = vpop.xlane.xlu0 %374  ;;  %v392_v0 = vpop.xlane.xlu1 %391 }
 0x22e   :  { %v379_v31 = vsub.f32 %v2292_v16, %v375_v61 }
 0x230   :  { %v386_v51 = vpop.xlane.xlu2 %385 }
 0x231   :  { %v394_v55 = vsub.f32 %v2280_v5, %v386_v51 }
 0x233   :  { %v420_v60 = vsel %vm418_vm5, %v415_v58, %v394_v55 }
 0x238   :  { %v403_v57 = vpop.xlane.xlu2 %402 }
 0x239   :  { %v411_v59 = vsub.f32 %v2280_v5, %v403_v57 }
 0x23b   :  { %v425_v62 = vsel %vm423_vm6, %v420_v60, %v411_v59 }
 0x23c   :  { %v430_v63 = vmul.f32 1.442695, %v425_v62 }
 0x23e   :  { %2068 = vpow2.f32 %v430_v63 }
 0x240   :  { %v355_v1 = vpop.xlane.xlu2 %354  ;;  %v2332_v2 = vpop.permute.xlu0 %176 }
 0x241   :  { %v185_v6 = vmul.f32 %v2332_v2, %v2200_v28  ;;  %v189_v8 = vmul.f32 %v2332_v2, %v2211_v34  ;;  %v361_v13 = vsub.f32 %v2284_v10, %v355_v1  ;;  %v197_v52 = vmul.f32 %v2332_v2, %v2242_v49 }
 0x242   :  { %v193_v53 = vmul.f32 %v2332_v2, %v2226_v42 }
 0x244   :  { %v2334_v3 = vpop.eup %2068 }
 0x245   :  { %1907 = vmatmul.msk.f32.gmra.mxu2 %vm103_vm0, %v2334_v3  ;;  %v2338_v4 = vpop.permute.xlu1 %174 }
 0x246   :  { %v184_v5 = vmul.f32 %v2338_v4, %v2200_v28  ;;  %v188_v7 = vmul.f32 %v2338_v4, %v2211_v34 }
 0x248   :  { %v372_v9 = vpop.xlane.xlu2 %371  ;;  %v1968_v11 = vpack.i.bf16 %v184_v5, %v185_v6  ;;  %v1978_v12 = vpack.i.bf16 %v188_v7, %v189_v8  ;;  %v2368_v39 = vpop.permute.xlu0 %170 }
 0x249   :  { %v378_v14 = vsub.f32 %v2284_v10, %v372_v9  ;;  %v396_v10 = vsub.f32 %v2292_v16, %v392_v0  ;;  %v190_v41 = vmul.f32 %v2368_v39, %v2226_v42  ;;  %v186_v33 = vmul.f32 %v2368_v39, %v2211_v34 }
 0x24a   :  { %1969 = vrot.lane.b32.xlu1 %v1968_v11, %s2158_s1  ;;  %1979 = vrot.lane.b32.xlu2 %v1978_v12, %s2158_s1  ;;  %v182_v44 = vmul.f32 %v2368_v39, %v2200_v28  ;;  %v194_v57 = vmul.f32 %v2368_v39, %v2242_v49 }
 0x24b   :  { %v416_v20 = vsel %vm346_vm3, %v361_v13, %v378_v14 }
 0x24c   :  { %v421_v22 = vsel %vm418_vm5, %v416_v20, %v395_v17 }
 0x24d   :  { %v426_v23 = vsel %vm423_vm6, %v421_v22, %v412_v18 }
 0x24e   :  { %v432_v25 = vmul.f32 1.442695, %v426_v23 }
 0x250   :  { %2070 = vpow2.f32 %v432_v25  ;;  %v358_v26 = vpop.xlane.xlu2 %357 }
 0x251   :  { %v362_v29 = vsub.f32 %v2292_v16, %v358_v26 }
 0x253   :  { %v417_v30 = vsel %vm346_vm3, %v362_v29, %v379_v31  ;;  %v83_v29 = vld [vmem:[#allocation2 + $0xf0] sm:$0xff] }
 0x254   :  { %v422_v36 = vsel %vm418_vm5, %v417_v30, %v396_v10  ;;  %v82_v10 = vld [vmem:[#allocation2 + $0xe8] sm:$0xff] }
 0x256   :  { %v2359_v27 = vpop.eup %2070 }
 0x257   :  { %1908 = vmatmul.msk.f32.gmra.mxu2 %vm103_vm0, %v2359_v27 }
 0x258   :  { %v409_v32 = vpop.xlane.xlu2 %408 }
 0x259   :  { %v413_v35 = vsub.f32 %v2292_v16, %v409_v32 }
 0x25b   :  { %v427_v37 = vsel %vm423_vm6, %v422_v36, %v413_v35 }
 0x25c   :  { %v434_v38 = vmul.f32 1.442695, %v427_v37 }
 0x25e   :  { %2072 = vpow2.f32 %v434_v38  ;;  %v81_v38 = vld [vmem:[#allocation2 + $0xe0] sm:$0xff] }
 0x260   :  { %v2370_v40 = vpop.permute.xlu2 %172 }
 0x261   :  { %v191_v43 = vmul.f32 %v2370_v40, %v2226_v42  ;;  %v187_v16 = vmul.f32 %v2370_v40, %v2211_v34  ;;  %v183_v45 = vmul.f32 %v2370_v40, %v2200_v28  ;;  %v196_v34 = vmul.f32 %v2338_v4, %v2242_v49 }
 0x262   :  { %v192_v28 = vmul.f32 %v2338_v4, %v2226_v42  ;;  %v195_v56 = vmul.f32 %v2370_v40, %v2242_v49 }
 0x263   :  { %v1993_v46 = vpack.i.bf16 %v190_v41, %v191_v43  ;;  %v1983_v47 = vpack.i.bf16 %v186_v33, %v187_v16  ;;  %v1973_v50 = vpack.i.bf16 %v182_v44, %v183_v45  ;;  %v1998_v54 = vpack.i.bf16 %v196_v34, %v197_v52  ;;  %v80_v16 = vld [vmem:[#allocation2 + $0xd8] sm:$0xff] }
 0x264   :  { %v2384_v51 = vpop.eup %2072  ;;  %v1988_v55 = vpack.i.bf16 %v192_v28, %v193_v53  ;;  %v2003_v58 = vpack.i.bf16 %v194_v57, %v195_v56 }
 0x265   :  { %1909 = vmatmul.msk.f32.gmra.mxu2 %vm103_vm0, %v2384_v51  ;;  %1994 = vrot.lane.b32.xlu2 %v1993_v46, %s2158_s1 }
 0x266   :  { %1984 = vrot.lane.b32.xlu1 %v1983_v47, %s2158_s1  ;;  %1974 = vrot.lane.b32.xlu0 %v1973_v50, %s2158_s1  ;;  %v2050_v47 = vld [vmem:[#allocation2 + $0xf8] ss:$0 sm:$0xff] }
 0x26e   :  { %1999 = vrot.lane.b32.xlu1 %v1998_v54, %s2158_s1  ;;  %1989 = vrot.lane.b32.xlu0 %v1988_v55, %s2158_s1 }
 0x276   :  { %2004 = vrot.lane.b32.xlu0 %v2003_v58, %s2158_s1 }
 0x2a4   :  { %v1980_v6 = vpop.permute.xlu2 %1979 }
 0x2a5   :  { %v1981_v9 = vunpack.i.l.bf16 %v1980_v6  ;;  %v1982_v11 = vunpack.i.h.bf16 %v1980_v6 }
 0x2aa   :  { %v465_v42 = vpop.f32.mrf.mxu2 }
 0x2ab   :  { %2074 = vrcp.f32 %v465_v42  ;;  %v2159_v42 = vmov 32.0  }
 0x2b1   :  { %v2075_v1 = vpop.eup %2074 }
 0x2b2   :  { %v481_v8 = vmul.f32 %v2075_v1, %v2321_v48 }
 0x2bc   :  { %v1970_v59 = vpop.permute.xlu1 %1969 }
 0x2bd   :  { %v1971_v60 = vunpack.i.l.bf16 %v1970_v59  ;;  %v1972_v61 = vunpack.i.h.bf16 %v1970_v59 }
 0x2bf   :  { %516 = vmatpush.msrb.mxu3 %v1971_v60  ;;  %v1995_v22 = vpop.permute.xlu2 %1994 }
 0x2c0   :  { %v1996_v30 = vunpack.i.l.bf16 %v1995_v22  ;;  %v1997_v32 = vunpack.i.h.bf16 %v1995_v22 }
 0x2c1   :  { %517 = vmatpush.msrb.mxu3 %v1972_v61 }
 0x2c8   :  { %v468_v62 = vpop.f32.mrf.mxu2 }
 0x2c9   :  { %2076 = vrcp.f32 %v468_v62 }
 0x2cf   :  { %v2077_v14 = vpop.eup %2076 }
 0x2d0   :  { %v482_v48 = vmul.f32 %v2077_v14, %v2334_v3 }
 0x2d8   :  { %v1985_v63 = vpop.permute.xlu1 %1984  ;;  %v1975_v0 = vpop.permute.xlu0 %1974 }
 0x2d9   :  { %v1976_v5 = vunpack.i.l.bf16 %v1975_v0  ;;  %v1977_v7 = vunpack.i.h.bf16 %v1975_v0  ;;  %v1986_v17 = vunpack.i.l.bf16 %v1985_v63  ;;  %v1987_v23 = vunpack.i.h.bf16 %v1985_v63 }
 0x2da   :  { %v471_v49 = vpop.f32.mrf.mxu2 }
 0x2db   :  { %518 = vmatpush.msrb.mxu3 %v1976_v5  ;;  %2078 = vrcp.f32 %v471_v49 }
 0x2dd   :  { %519 = vmatpush.msrb.mxu3 %v1977_v7 }
 0x2de   :  { %1910 = vmatmul.msk.f32.vlgmr.msrb.gmra.mxu3 %vm103_vm0, %v481_v8 }
 0x2df   :  { %555 = vmatpush.msra.mxu3 %v1981_v9 }
 0x2e0   :  { %v2000_v12 = vpop.permute.xlu1 %1999  ;;  %v1990_v13 = vpop.permute.xlu0 %1989 }
 0x2e1   :  { %v2001_v18 = vunpack.i.l.bf16 %v2000_v12  ;;  %v1991_v20 = vunpack.i.l.bf16 %v1990_v13  ;;  %556 = vmatpush.msra.mxu3 %v1982_v11  ;;  %v1992_v25 = vunpack.i.h.bf16 %v1990_v13  ;;  %v2002_v26 = vunpack.i.h.bf16 %v2000_v12  ;;  %v2079_v31 = vpop.eup %2078 }
 0x2e2   :  { %v483_v35 = vmul.f32 %v2079_v31, %v2359_v27 }
 0x2e3   :  { %557 = vmatpush.msra.mxu3 %v1986_v17  ;;  %594 = vmatpush.msra.mxu2 %v1991_v20 }
 0x2e4   :  { %633 = vmatpush.msra.mxu1 %v2001_v18 }
 0x2e5   :  { %558 = vmatpush.msra.mxu3 %v1987_v23  ;;  %595 = vmatpush.msra.mxu2 %v1992_v25 }
 0x2e6   :  { %634 = vmatpush.msra.mxu1 %v2002_v26  ;;  %1911 = vmatmul.msk.f32.vlgmr.msra.gmra.mxu3 %vm103_vm0, %v482_v48 }
 0x2e7   :  { %596 = vmatpush.msra.mxu2 %v1996_v30  ;;  %666 = vmatpush.msrb.mxu3 %v83_v29  ;;  %v88_v30 = vld [vmem:[#allocation2 + $0x118] sm:$0xff] }
 0x2e8   :  { %v2005_v36 = vpop.permute.xlu0 %2004  ;;  %v474_v37 = vpop.f32.mrf.mxu2  ;;  %817 = vmatpush.msrb.mxu0 %v88_v30 }
 0x2e9   :  { %v2006_v3 = vunpack.i.l.bf16 %v2005_v36  ;;  %2080 = vrcp.f32 %v474_v37  ;;  %597 = vmatpush.msra.mxu2 %v1997_v32  ;;  %667 = vmatpush.msrb.mxu3 %v82_v10  ;;  %v2007_v41 = vunpack.i.h.bf16 %v2005_v36  ;;  %v87_v10 = vld [vmem:[#allocation2 + $0x110] sm:$0xff]  ;;  %v86_v32 = vld [vmem:[#allocation2 + $0x108] sm:$0xff] }
 0x2ea   :  { %1912 = vmatmul.msk.f32.vlgmr.msra.gmra.mxu2 %vm103_vm0, %v483_v35  ;;  %2082 = vrcp.f32 %v2159_v42  ;;  %818 = vmatpush.msrb.mxu0 %v87_v10  ;;  %v85_v35 = vld [vmem:[#allocation2 + $0x100] sm:$0xff] }
 0x2eb   :  { %635 = vmatpush.msra.mxu1 %v2006_v3  ;;  %668 = vmatpush.msrb.mxu3 %v81_v38 }
 0x2ec   :  { %819 = vmatpush.msrb.mxu0 %v86_v32 }
 0x2ed   :  { %636 = vmatpush.msra.mxu1 %v2007_v41  ;;  %669 = vmatpush.msrb.mxu3 %v80_v16 }
 0x2ee   :  { %820 = vmatpush.msrb.mxu0 %v85_v35 }
 0x2ef   :  { %v2081_v33 = vpop.eup %2080 }
 0x2f0   :  { %v484_v43 = vmul.f32 %v2081_v33, %v2384_v51  ;;  %v2083_v62 = vpop.eup %2082 }
 0x2f1   :  { %v700_v63 = vmul.f32 32.0, %v2083_v62  ;;  %vm704_vm7 = vweird.f32 %v2083_v62 }
 0x2f2   :  { %1913 = vmatmul.msk.f32.vlgmr.msra.gmra.mxu1 %vm103_vm0, %v484_v43 }
 0x2f3   :  { %v701_v0 = vsub.f32 1.0, %v700_v63 }
 0x361   :  { %v521_v27 = vpop.f32.mrf.mxu3 }
 0x362   :  { %1914 = vmatmul.msk.f32.vlgmr.msrb.gmra.mxu3 %vm103_vm0, %v521_v27 }
 0x369   :  { %v560_v44 = vpop.f32.mrf.mxu3 }
 0x36a   :  { %1915 = vmatmul.msk.f32.gmra.mxu3 %vm103_vm0, %v560_v44 }
 0x36d   :  { %v599_v45 = vpop.f32.mrf.mxu2 }
 0x36f   :  { %v638_v46 = vpop.f32.mrf.mxu1 }
 0x372   :  { %1916 = vmatmul.msk.f32.gmra.mxu3 %vm103_vm0, %v599_v45 }
 0x37a   :  { %1917 = vmatmul.msk.f32.gmra.mxu3 %vm103_vm0, %v638_v46 }
 0x3e5   :  { %v671_v50 = vpop.f32.mrf.mxu3 }
 0x3e6   :  { %v672_v34 = vadd.f32 %v2050_v47, %v671_v50 }
 0x3e8   :  { %v2419_v51 = vadd.f32 %v672_v34, %v2182_v15 }
 0x3ea   :  { %v687_v28 = vsel %vm103_vm0, %v2419_v51, 0.0 }
 0x3eb   :  { %688 = vadd.xlane.f32.xlu2 %v687_v28 }
 0x3ed   :  { %v674_v52 = vpop.f32.mrf.mxu3 }
 0x3ee   :  { %v675_v53 = vadd.f32 %v2050_v47, %v674_v52 }
 0x3f0   :  { %v2424_v54 = vadd.f32 %v675_v53, %v2186_v19  ;;  %v2051_v53 = vld [vmem:[#allocation2 + $0xc8] ss:$0 sm:$0xff] }
 0x3f2   :  { %v690_v55 = vsel %vm103_vm0, %v2424_v54, 0.0 }
 0x3f3   :  { %691 = vadd.xlane.f32.xlu1 %v690_v55 }
 0x3f5   :  { %v677_v56 = vpop.f32.mrf.mxu3 }
 0x3f6   :  { %v678_v57 = vadd.f32 %v2050_v47, %v677_v56 }
 0x3f8   :  { %v2429_v58 = vadd.f32 %v678_v57, %v2190_v21  ;;  %v702_v21 = vmul.f32 %v2083_v62, %v701_v0 }
 0x3fa   :  { %v693_v15 = vsel %vm103_vm0, %v2429_v58, 0.0  ;;  %v703_v1 = vadd.f32 %v2083_v62, %v702_v21 }
 0x3fb   :  { %694 = vadd.xlane.f32.xlu0 %v693_v15  ;;  %v2052_v15 = vld [vmem:[#allocation2 + $0xd0] ss:$0 sm:$0xff] }
 0x3fc   :  { %v2438_v5 = vsel %vm704_vm7, %v2083_v62, %v703_v1 }
 0x3fd   :  { %v680_v59 = vpop.f32.mrf.mxu3 }
 0x3fe   :  { %v681_v60 = vadd.f32 %v2050_v47, %v680_v59 }
 0x400   :  { %v2434_v61 = vadd.f32 %v681_v60, %v2194_v24 }
 0x402   :  { %v696_v19 = vsel %vm103_vm0, %v2434_v61, 0.0 }
 0x403   :  { %697 = vadd.xlane.f32.xlu2 %v696_v19 }
 0x45e   :  { %v689_v6 = vpop.xlane.xlu2 %688 }
 0x45f   :  { %v706_v7 = vmul.f32 %v2438_v5, %v689_v6 }
 0x461   :  { %v710_v24 = vsub.f32 %v2419_v51, %v706_v7 }
 0x463   :  { %v714_v49 = vmul.f32 %v710_v24, %v710_v24 }
 0x465   :  { %v718_v8 = vsel %vm103_vm0, %v714_v49, 0.0 }
 0x466   :  { %v692_v9 = vpop.xlane.xlu1 %691  ;;  %719 = vadd.xlane.f32.xlu1 %v718_v8 }
 0x467   :  { %v707_v11 = vmul.f32 %v2438_v5, %v692_v9 }
 0x469   :  { %v2445_v12 = vsub.f32 %v2424_v54, %v707_v11 }
 0x46b   :  { %v715_v13 = vmul.f32 %v2445_v12, %v2445_v12 }
 0x46d   :  { %v721_v14 = vsel %vm103_vm0, %v715_v13, 0.0 }
 0x46e   :  { %v695_v17 = vpop.xlane.xlu0 %694  ;;  %722 = vadd.xlane.f32.xlu0 %v721_v14 }
 0x46f   :  { %v708_v18 = vmul.f32 %v2438_v5, %v695_v17 }
 0x471   :  { %v2452_v20 = vsub.f32 %v2429_v58, %v708_v18 }
 0x473   :  { %v716_v22 = vmul.f32 %v2452_v20, %v2452_v20 }
 0x475   :  { %v724_v23 = vsel %vm103_vm0, %v716_v22, 0.0 }
 0x476   :  { %725 = vadd.xlane.f32.xlu2 %v724_v23  ;;  %v698_v25 = vpop.xlane.xlu2 %697 }
 0x477   :  { %v709_v48 = vmul.f32 %v2438_v5, %v698_v25 }
 0x479   :  { %v2459_v26 = vsub.f32 %v2434_v61, %v709_v48 }
 0x47b   :  { %v717_v29 = vmul.f32 %v2459_v26, %v2459_v26 }
 0x47d   :  { %v727_v31 = vsel %vm103_vm0, %v717_v29, 0.0 }
 0x47e   :  { %728 = vadd.xlane.f32.xlu1 %v727_v31 }
 0x4d9   :  { %v720_v36 = vpop.xlane.xlu1 %719 }
 0x4da   :  { %v730_v37 = vmul.f32 %v720_v36, %v2438_v5 }
 0x4dc   :  { %v734_v38 = vadd.f32 1e-05, %v730_v37  ;;  %v2053_v37 = vld [vmem:[#allocation2 + $0x120] ss:$0 sm:$0xff] }
 0x4de   :  { %2084 = vrsqrt.f32 %v734_v38  ;;  %vm744_vm9 = vweird.f32 %v734_v38 }
 0x4e1   :  { %v723_v3 = vpop.xlane.xlu0 %722 }
 0x4e2   :  { %v731_v41 = vmul.f32 %v723_v3, %v2438_v5 }
 0x4e4   :  { %v2085_v33 = vpop.eup %2084  ;;  %v735_v43 = vadd.f32 1e-05, %v731_v41 }
 0x4e5   :  { %v739_v16 = vmul.f32 %v2085_v33, %v734_v38  ;;  %vm745_vm8 = vweird.f32 %v2085_v33 }
 0x4e6   :  { %2086 = vrsqrt.f32 %v735_v43  ;;  %vm746_vm10 = vmor %vm744_vm9, %vm745_vm8  ;;  %vm754_vm12 = vweird.f32 %v735_v43  ;;  %vm859_vm8 = vcmask 523264  }
 0x4e7   :  { %v740_v27 = vmul.f32 %v2085_v33, %v739_v16 }
 0x4e9   :  { %v741_v44 = vmul.f32 0.5, %v740_v27  ;;  %v726_v45 = vpop.xlane.xlu2 %725 }
 0x4ea   :  { %v732_v46 = vmul.f32 %v726_v45, %v2438_v5 }
 0x4eb   :  { %v742_v47 = vsub.f32 1.5, %v741_v44 }
 0x4ec   :  { %v2087_v50 = vpop.eup %2086  ;;  %v736_v34 = vadd.f32 1e-05, %v732_v46 }
 0x4ed   :  { %v743_v28 = vmul.f32 %v2085_v33, %v742_v47  ;;  %v749_v52 = vmul.f32 %v2087_v50, %v735_v43  ;;  %vm755_vm11 = vweird.f32 %v2087_v50  ;;  %v97_v47 = vld [vmem:[#allocation2 + $0x160] sm:$0xff] }
 0x4ee   :  { %2088 = vrsqrt.f32 %v736_v34  ;;  %vm756_vm13 = vmor %vm754_vm12, %vm755_vm11  ;;  %vm764_vm15 = vweird.f32 %v736_v34  ;;  %880 = vmatpush.msrb.mxu1 %v97_v47 }
 0x4ef   :  { %v747_v55 = vsel %vm746_vm10, %v2085_v33, %v743_v28  ;;  %v750_v56 = vmul.f32 %v2087_v50, %v749_v52  ;;  %v94_v28 = vld [vmem:[#allocation2 + $0x148] sm:$0xff]  ;;  %v93_v52 = vld [vmem:[#allocation2 + $0x140] sm:$0xff] }
 0x4f0   :  { %v778_v57 = vmul.f32 %v747_v55, %v710_v24  ;;  %v91_v55 = vld [vmem:[#allocation2 + $0x130] sm:$0xff] }
 0x4f1   :  { %v751_v59 = vmul.f32 0.5, %v750_v56  ;;  %v729_v60 = vpop.xlane.xlu1 %728  ;;  %v90_v56 = vld [vmem:[#allocation2 + $0x128] sm:$0xff] }
 0x4f2   :  { %v733_v19 = vmul.f32 %v729_v60, %v2438_v5  ;;  %v783_v42 = vmul.f32 %v2051_v53, %v778_v57 }
 0x4f3   :  { %v752_v62 = vsub.f32 1.5, %v751_v59 }
 0x4f4   :  { %v2089_v63 = vpop.eup %2088  ;;  %v737_v0 = vadd.f32 1e-05, %v733_v19  ;;  %v788_v21 = vadd.f32 %v2052_v15, %v783_v42 }
 0x4f5   :  { %v753_v1 = vmul.f32 %v2087_v50, %v752_v62  ;;  %v759_v6 = vmul.f32 %v2089_v63, %v736_v34  ;;  %vm765_vm14 = vweird.f32 %v2089_v63  ;;  %v95_v34 = vld [vmem:[#allocation2 + $0x150] sm:$0xff] }
 0x4f6   :  { %2090 = vrsqrt.f32 %v737_v0  ;;  %1918 = vmatmul.msk.f32.vlgmr.msrb.gmra.mxu0 %vm103_vm0, %v788_v21  ;;  %vm766_vm1 = vmor %vm764_vm15, %vm765_vm14  ;;  %vm774_vm4 = vweird.f32 %v737_v0 }
 0x4f7   :  { %v757_v7 = vsel %vm756_vm13, %v2087_v50, %v753_v1  ;;  %v760_v24 = vmul.f32 %v2089_v63, %v759_v6  ;;  %v96_v50 = vld [vmem:[#allocation2 + $0x158] sm:$0xff] }
 0x4f8   :  { %v779_v49 = vmul.f32 %v757_v7, %v2445_v12  ;;  %881 = vmatpush.msrb.mxu1 %v96_v50 }
 0x4f9   :  { %v761_v8 = vmul.f32 0.5, %v760_v24 }
 0x4fa   :  { %v784_v9 = vmul.f32 %v2051_v53, %v779_v49  ;;  %882 = vmatpush.msrb.mxu1 %v95_v34 }
 0x4fb   :  { %v762_v11 = vsub.f32 1.5, %v761_v8 }
 0x4fc   :  { %v2091_v13 = vpop.eup %2090  ;;  %v789_v14 = vadd.f32 %v2052_v15, %v784_v9  ;;  %883 = vmatpush.msrb.mxu1 %v94_v28 }
 0x4fd   :  { %v763_v17 = vmul.f32 %v2089_v63, %v762_v11  ;;  %v769_v18 = vmul.f32 %v2091_v13, %v737_v0  ;;  %vm775_vm2 = vweird.f32 %v2091_v13  ;;  %v2054_v0 = vld [vmem:[#allocation2 + $0x168] ss:$0 sm:$0xff] }
 0x4fe   :  { %1919 = vmatmul.msk.f32.gmra.mxu0 %vm103_vm0, %v789_v14  ;;  %vm776_vm7 = vmor %vm774_vm4, %vm775_vm2  ;;  %884 = vmatpush.msrb.mxu1 %v93_v52 }
 0x4ff   :  { %v767_v22 = vsel %vm766_vm1, %v2089_v63, %v763_v17  ;;  %v770_v23 = vmul.f32 %v2091_v13, %v769_v18 }
 0x500   :  { %v780_v25 = vmul.f32 %v767_v22, %v2452_v20 }
 0x501   :  { %v771_v48 = vmul.f32 0.5, %v770_v23 }
 0x502   :  { %v785_v29 = vmul.f32 %v2051_v53, %v780_v25 }
 0x503   :  { %v772_v31 = vsub.f32 1.5, %v771_v48 }
 0x504   :  { %v790_v12 = vadd.f32 %v2052_v15, %v785_v29 }
 0x505   :  { %v773_v30 = vmul.f32 %v2091_v13, %v772_v31 }
 0x506   :  { %1920 = vmatmul.msk.f32.gmra.mxu0 %vm103_vm0, %v790_v12 }
 0x507   :  { %v777_v10 = vsel %vm776_vm7, %v2091_v13, %v773_v30 }
 0x508   :  { %v781_v32 = vmul.f32 %v777_v10, %v2459_v26 }
 0x50a   :  { %v786_v35 = vmul.f32 %v2051_v53, %v781_v32  ;;  %v92_v53 = vld [vmem:[#allocation2 + $0x138] sm:$0xff] }
 0x50b   :  { %885 = vmatpush.msrb.mxu1 %v92_v53 }
 0x50c   :  { %v791_v36 = vadd.f32 %v2052_v15, %v786_v35 }
 0x50d   :  { %886 = vmatpush.msrb.mxu1 %v91_v55 }
 0x50e   :  { %1921 = vmatmul.msk.f32.gmra.mxu0 %vm103_vm0, %v791_v36 }
 0x50f   :  { %887 = vmatpush.msrb.mxu1 %v90_v56 }
 0x573   :  { %v822_v38 = vpop.f32.mrf.mxu0 }
 0x574   :  { %v823_v20 = vadd.f32 %v2053_v37, %v822_v38 }
 0x576   :  { %v834_v3 = vmax.f32 %v823_v20, 0.0 }
 0x578   :  { %842 = vrot.lane.b32.xlu0 %v834_v3, %s2160_s18 }
 0x57b   :  { %v825_v41 = vpop.f32.mrf.mxu0 }
 0x57c   :  { %v826_v33 = vadd.f32 %v2053_v37, %v825_v41 }
 0x57e   :  { %v835_v43 = vmax.f32 %v826_v33, 0.0 }
 0x580   :  { %844 = vrot.lane.b32.xlu2 %v835_v43, %s2160_s18 }
 0x583   :  { %v828_v16 = vpop.f32.mrf.mxu0 }
 0x584   :  { %v829_v27 = vadd.f32 %v2053_v37, %v828_v16  ;;  %v908_v16 = vld [vmem:[#allocation2 + $0x190] sm:$0xff] }
 0x585   :  { %1058 = vmatpush.msrb.mxu2 %v908_v16 }
 0x586   :  { %v836_v44 = vmax.f32 %v829_v27, 0.0 }
 0x588   :  { %846 = vrot.lane.b32.xlu1 %v836_v44, %s2160_s18  ;;  %v906_v44 = vld [vmem:[#allocation2 + $0x180] sm:$0xff] }
 0x58b   :  { %v831_v26 = vpop.f32.mrf.mxu0 }
 0x58c   :  { %v832_v45 = vadd.f32 %v2053_v37, %v831_v26  ;;  %v905_v26 = vld [vmem:[#allocation2 + $0x178] sm:$0xff] }
 0x58e   :  { %v837_v46 = vmax.f32 %v832_v45, 0.0 }
 0x590   :  { %848 = vrot.lane.b32.xlu0 %v837_v46, %s2160_s18 }
 0x5da   :  { %v845_v59 = vpop.permute.xlu2 %844 }
 0x5db   :  { %v855_v60 = vmul.f32 %v845_v59, %v826_v33 }
 0x5ea   :  { %v843_v57 = vpop.permute.xlu0 %842 }
 0x5eb   :  { %v854_v15 = vmul.f32 %v843_v57, %v823_v20 }
 0x5ed   :  { %1922 = vmatmul.msk.f32.vlgmr.msrb.gmra.mxu1 %vm859_vm8, %v854_v15 }
 0x5f5   :  { %1923 = vmatmul.msk.f32.gmra.mxu1 %vm859_vm8, %v855_v60 }
 0x5fa   :  { %v847_v19 = vpop.permute.xlu1 %846 }
 0x5fb   :  { %v856_v42 = vmul.f32 %v847_v19, %v829_v27  ;;  %v907_v27 = vld [vmem:[#allocation2 + $0x188] sm:$0xff] }
 0x5fc   :  { %1059 = vmatpush.msrb.mxu2 %v907_v27 }
 0x5fd   :  { %1924 = vmatmul.msk.f32.gmra.mxu1 %vm859_vm8, %v856_v42 }
 0x5fe   :  { %1060 = vmatpush.msrb.mxu2 %v906_v44 }
 0x600   :  { %1061 = vmatpush.msrb.mxu2 %v905_v26 }
 0x602   :  { %v849_v62 = vpop.permute.xlu0 %848 }
 0x603   :  { %v857_v63 = vmul.f32 %v849_v62, %v832_v45 }
 0x605   :  { %1925 = vmatmul.msk.f32.gmra.mxu1 %vm859_vm8, %v857_v63  ;;  %v2055_v63 = vld [vmem:[#allocation2 + $0x1a8] ss:$0 sm:$0xff] }
 0x66a   :  { %v889_v21 = vpop.f32.mrf.mxu1 }
 0x66b   :  { %v890_v1 = vadd.f32 %v2054_v0, %v889_v21 }
 0x66d   :  { %v2484_v6 = vadd.f32 %v890_v1, %v2419_v51 }
 0x66f   :  { %v935_v7 = vsel %vm103_vm0, %v2484_v6, 0.0 }
 0x670   :  { %936 = vadd.xlane.f32.xlu2 %v935_v7  ;;  %v2056_v7 = vld [vmem:[#allocation2 + $0x1b0] ss:$0 sm:$0xff] }
 0x672   :  { %v892_v24 = vpop.f32.mrf.mxu1 }
 0x673   :  { %v893_v49 = vadd.f32 %v2054_v0, %v892_v24 }
 0x675   :  { %v2489_v8 = vadd.f32 %v893_v49, %v2424_v54 }
 0x677   :  { %v938_v9 = vsel %vm103_vm0, %v2489_v8, 0.0 }
 0x678   :  { %939 = vadd.xlane.f32.xlu0 %v938_v9 }
 0x67a   :  { %v895_v11 = vpop.f32.mrf.mxu1 }
 0x67b   :  { %v896_v13 = vadd.f32 %v2054_v0, %v895_v11 }
 0x67d   :  { %v2494_v14 = vadd.f32 %v896_v13, %v2429_v58 }
 0x67f   :  { %v941_v51 = vsel %vm103_vm0, %v2494_v14, 0.0 }
 0x680   :  { %942 = vadd.xlane.f32.xlu1 %v941_v51 }
 0x682   :  { %v898_v17 = vpop.f32.mrf.mxu1 }
 0x683   :  { %v899_v18 = vadd.f32 %v2054_v0, %v898_v17 }
 0x685   :  { %v2499_v22 = vadd.f32 %v899_v18, %v2434_v61 }
 0x687   :  { %v944_v54 = vsel %vm103_vm0, %v2499_v22, 0.0 }
 0x688   :  { %945 = vadd.xlane.f32.xlu2 %v944_v54 }
 0x6e3   :  { %v937_v23 = vpop.xlane.xlu2 %936 }
 0x6e4   :  { %v947_v25 = vmul.f32 %v937_v23, %v2438_v5 }
 0x6e6   :  { %v951_v48 = vsub.f32 %v2484_v6, %v947_v25 }
 0x6e8   :  { %v955_v58 = vmul.f32 %v951_v48, %v951_v48 }
 0x6ea   :  { %v959_v29 = vsel %vm103_vm0, %v955_v58, 0.0 }
 0x6eb   :  { %v940_v31 = vpop.xlane.xlu0 %939  ;;  %960 = vadd.xlane.f32.xlu0 %v959_v29 }
 0x6ec   :  { %v948_v12 = vmul.f32 %v940_v31, %v2438_v5 }
 0x6ee   :  { %v2508_v30 = vsub.f32 %v2489_v8, %v948_v12 }
 0x6f0   :  { %v956_v61 = vmul.f32 %v2508_v30, %v2508_v30 }
 0x6f2   :  { %v962_v10 = vsel %vm103_vm0, %v956_v61, 0.0 }
 0x6f3   :  { %v943_v32 = vpop.xlane.xlu1 %942  ;;  %963 = vadd.xlane.f32.xlu1 %v962_v10 }
 0x6f4   :  { %v949_v35 = vmul.f32 %v943_v32, %v2438_v5 }
 0x6f6   :  { %v2515_v36 = vsub.f32 %v2494_v14, %v949_v35 }
 0x6f8   :  { %v957_v37 = vmul.f32 %v2515_v36, %v2515_v36 }
 0x6fa   :  { %v965_v38 = vsel %vm103_vm0, %v957_v37, 0.0 }
 0x6fb   :  { %966 = vadd.xlane.f32.xlu2 %v965_v38  ;;  %v946_v20 = vpop.xlane.xlu2 %945 }
 0x6fc   :  { %v950_v3 = vmul.f32 %v946_v20, %v2438_v5 }
 0x6fe   :  { %v2522_v41 = vsub.f32 %v2499_v22, %v950_v3 }
 0x700   :  { %v958_v33 = vmul.f32 %v2522_v41, %v2522_v41 }
 0x702   :  { %v968_v43 = vsel %vm103_vm0, %v958_v33, 0.0 }
 0x703   :  { %969 = vadd.xlane.f32.xlu0 %v968_v43 }
 0x75e   :  { %v961_v45 = vpop.xlane.xlu0 %960 }
 0x75f   :  { %v971_v46 = vmul.f32 %v961_v45, %v2438_v5 }
 0x761   :  { %v975_v47 = vadd.f32 1e-05, %v971_v46  ;;  %v2057_v46 = vld [vmem:[#allocation2 + $0x198] ss:$0 sm:$0xff] }
 0x763   :  { %2092 = vrsqrt.f32 %v975_v47  ;;  %vm985_vm10 = vweird.f32 %v975_v47 }
 0x766   :  { %v964_v50 = vpop.xlane.xlu1 %963 }
 0x767   :  { %v972_v34 = vmul.f32 %v964_v50, %v2438_v5  ;;  %v2120_v50 = vld [vmem:[#allocation2 + $0x28] sm:$0xff] }
 0x769   :  { %v2093_v28 = vpop.eup %2092  ;;  %v976_v52 = vadd.f32 1e-05, %v972_v34 }
 0x76a   :  { %v980_v53 = vmul.f32 %v2093_v28, %v975_v47  ;;  %vm986_vm9 = vweird.f32 %v2093_v28 }
 0x76b   :  { %2094 = vrsqrt.f32 %v976_v52  ;;  %vm987_vm11 = vmor %vm985_vm10, %vm986_vm9  ;;  %vm995_vm13 = vweird.f32 %v976_v52  ;;  %vm1276_vm10 = vcmask 122944  }
 0x76c   :  { %v981_v55 = vmul.f32 %v2093_v28, %v980_v53 }
 0x76e   :  { %v982_v56 = vmul.f32 0.5, %v981_v55  ;;  %v967_v57 = vpop.xlane.xlu2 %966 }
 0x76f   :  { %v973_v15 = vmul.f32 %v967_v57, %v2438_v5 }
 0x770   :  { %v983_v59 = vsub.f32 1.5, %v982_v56 }
 0x771   :  { %v2095_v60 = vpop.eup %2094  ;;  %v977_v19 = vadd.f32 1e-05, %v973_v15 }
 0x772   :  { %v984_v42 = vmul.f32 %v2093_v28, %v983_v59  ;;  %v990_v62 = vmul.f32 %v2095_v60, %v976_v52  ;;  %vm996_vm12 = vweird.f32 %v2095_v60 }
 0x773   :  { %2096 = vrsqrt.f32 %v977_v19  ;;  %vm997_vm14 = vmor %vm995_vm13, %vm996_vm12  ;;  %vm1005_vm1 = vweird.f32 %v977_v19  ;;  %vm1293_vm12 = vcmask 188544   ;;  %vm1310_vm13 = vcmask 254144  }
 0x774   :  { %v988_v0 = vsel %vm987_vm11, %v2093_v28, %v984_v42  ;;  %v991_v21 = vmul.f32 %v2095_v60, %v990_v62  ;;  %v2539_v28 = vld [vmem:[#allocation2 + $0x20] sm:$0xff]  ;;  %vm1259_vm11 = vcmask 57344  }
 0x775   :  { %v1019_v1 = vmul.f32 %v988_v0, %v951_v48 }
 0x776   :  { %v992_v24 = vmul.f32 0.5, %v991_v21  ;;  %v970_v49 = vpop.xlane.xlu0 %969 }
 0x777   :  { %v1024_v9 = vmul.f32 %v2055_v63, %v1019_v1  ;;  %v974_v11 = vmul.f32 %v970_v49, %v2438_v5 }
 0x778   :  { %v993_v13 = vsub.f32 1.5, %v992_v24  ;;  %v2123_v24 = vld [vmem:[#allocation2 + $0x10] sm:$0xff] }
 0x779   :  { %v2097_v51 = vpop.eup %2096  ;;  %v978_v17 = vadd.f32 1e-05, %v974_v11  ;;  %v1029_v18 = vadd.f32 %v2056_v7, %v1024_v9  ;;  %v910_v11 = vld [vmem:[#allocation2 + $0x1a0] sm:$0x1] }
 0x77a   :  { %v994_v54 = vmul.f32 %v2095_v60, %v993_v13  ;;  %v1000_v23 = vmul.f32 %v2097_v51, %v977_v19  ;;  %vm1006_vm15 = vweird.f32 %v2097_v51 }
 0x77b   :  { %2098 = vrsqrt.f32 %v978_v17  ;;  %1926 = vmatmul.msk.f32.vlgmr.msrb.gmra.mxu2 %vm103_vm0, %v1029_v18  ;;  %vm1007_vm2 = vmor %vm1005_vm1, %vm1006_vm15  ;;  %vm1015_vm7 = vweird.f32 %v978_v17 }
 0x77c   :  { %v998_v25 = vsel %vm997_vm14, %v2095_v60, %v994_v54  ;;  %v1001_v48 = vmul.f32 %v2097_v51, %v1000_v23  ;;  %v2124_v54 = vld [vmem:[#allocation2 + $0x48] sm:$0xff]  ;;  %vm1352_vm14 = vcmask 1041409  }
 0x77d   :  { %v1020_v58 = vmul.f32 %v998_v25, %v2508_v30 }
 0x77e   :  { %v1002_v29 = vmul.f32 0.5, %v1001_v48  ;;  %v2125_v48 = vld [vmem:[#allocation2 + $0x40] sm:$0xff] }
 0x77f   :  { %v1025_v31 = vmul.f32 %v2055_v63, %v1020_v58 }
 0x780   :  { %v1003_v12 = vsub.f32 1.5, %v1002_v29 }
 0x781   :  { %v2099_v61 = vpop.eup %2098  ;;  %v1030_v10 = vadd.f32 %v2056_v7, %v1025_v31 }
 0x782   :  { %v1004_v32 = vmul.f32 %v2097_v51, %v1003_v12  ;;  %v1010_v35 = vmul.f32 %v2099_v61, %v978_v17  ;;  %vm1016_vm4 = vweird.f32 %v2099_v61  ;;  %v2126_v12 = vld [vmem:[#allocation2 + $0x38] sm:$0xff] }
 0x783   :  { %1927 = vmatmul.msk.f32.gmra.mxu2 %vm103_vm0, %v1030_v10  ;;  %vm1017_vm9 = vmor %vm1015_vm7, %vm1016_vm4 }
 0x784   :  { %v1008_v37 = vsel %vm1007_vm2, %v2097_v51, %v1004_v32  ;;  %v1011_v38 = vmul.f32 %v2099_v61, %v1010_v35  ;;  %v2127_v32 = vld [vmem:[#allocation2 + $0x30] sm:$0xff] }
 0x785   :  { %v1021_v20 = vmul.f32 %v1008_v37, %v2515_v36 }
 0x786   :  { %v1012_v3 = vmul.f32 0.5, %v1011_v38 }
 0x787   :  { %v1026_v33 = vmul.f32 %v2055_v63, %v1021_v20 }
 0x788   :  { %v1013_v43 = vsub.f32 1.5, %v1012_v3 }
 0x789   :  { %v1031_v30 = vadd.f32 %v2056_v7, %v1026_v33 }
 0x78a   :  { %v1014_v16 = vmul.f32 %v2099_v61, %v1013_v43 }
 0x78b   :  { %1928 = vmatmul.msk.f32.gmra.mxu2 %vm103_vm0, %v1031_v30 }
 0x78c   :  { %v1018_v27 = vsel %vm1017_vm9, %v2099_v61, %v1014_v16 }
 0x78d   :  { %v1022_v44 = vmul.f32 %v1018_v27, %v2522_v41  ;;  %v2543_v41 = vld [vmem:[#allocation2 + $0x18] sm:$0xff] }
 0x78f   :  { %v1027_v26 = vmul.f32 %v2055_v63, %v1022_v44 }
 0x791   :  { %v1032_v45 = vadd.f32 %v2056_v7, %v1027_v26 }
 0x793   :  { %1929 = vmatmul.msk.f32.gmra.mxu2 %vm103_vm0, %v1032_v45 }
 0x7fe   :  { %v1063_v47 = vpop.f32.mrf.mxu2 }
 0x7ff   :  { %v1064_v36 = vadd.f32 %v2057_v46, %v1063_v47 }
 0x801   :  { %v1082_v34 = vmul.f32 %v2120_v50, %v1064_v36  ;;  %v1081_v52 = vmul.f32 %v2539_v28, %v1064_v36  ;;  %v1080_v56 = vmul.f32 %v2543_v41, %v1064_v36  ;;  %v2547_v15 = vmul.f32 %v1064_v36, %v2338_v4 }
 0x802   :  { %v2550_v59 = vmul.f32 %v1064_v36, %v2332_v2  ;;  %v2559_v42 = vmul.f32 %v1064_v36, %v2368_v39  ;;  %v2567_v63 = vmul.f32 %v1064_v36, %v2370_v40  ;;  %v1079_v49 = vmul.f32 %v2123_v24, %v1064_v36 }
 0x803   :  { %1930 = vmatpush.xpose.msk.msra.mxu3 %vm103_vm0, %v1082_v34  ;;  %v1075_v18 = vmul.f32 %v1064_v36, %v910_v11 }
 0x806   :  { %v1066_v53 = vpop.f32.mrf.mxu2 }
 0x807   :  { %v1067_v55 = vadd.f32 %v2057_v46, %v1066_v53  ;;  %1931 = vmatpush.xpose.msk.msra.mxu3 %vm103_vm0, %v1081_v52 }
 0x809   :  { %v1086_v57 = vmul.f32 %v2120_v50, %v1067_v55  ;;  %v2553_v60 = vmul.f32 %v1067_v55, %v2338_v4  ;;  %v2556_v19 = vmul.f32 %v1067_v55, %v2332_v2  ;;  %v2562_v62 = vmul.f32 %v1067_v55, %v2368_v39 }
 0x80a   :  { %v2570_v0 = vmul.f32 %v1067_v55, %v2370_v40  ;;  %v1085_v9 = vmul.f32 %v2539_v28, %v1067_v55  ;;  %v1084_v23 = vmul.f32 %v2543_v41, %v1067_v55  ;;  %v1083_v58 = vmul.f32 %v2123_v24, %v1067_v55 }
 0x80b   :  { %1932 = vmatpush.xpose.msk.msra.mxu3 %vm103_vm0, %v1080_v56  ;;  %1935 = vmatpush.xpose.msk.msra.mxu0 %vm103_vm0, %v1086_v57  ;;  %v2013_v21 = vpack.i.bf16 %v2553_v60, %v2547_v15  ;;  %v2008_v1 = vpack.i.bf16 %v2556_v19, %v2550_v59  ;;  %v2023_v7 = vpack.i.bf16 %v2562_v62, %v2559_v42 }
 0x80c   :  { %v2018_v13 = vpack.i.bf16 %v2570_v0, %v2567_v63  ;;  %v1076_v10 = vmul.f32 %v1067_v55, %v910_v11 }
 0x80e   :  { %v1069_v51 = vpop.f32.mrf.mxu2 }
 0x80f   :  { %v1070_v17 = vadd.f32 %v2057_v46, %v1069_v51  ;;  %1933 = vmatpush.xpose.msk.msra.mxu3 %vm103_vm0, %v1079_v49  ;;  %1936 = vmatpush.xpose.msk.msra.mxu0 %vm103_vm0, %v1085_v9 }
 0x811   :  { %v1090_v25 = vmul.f32 %v2120_v50, %v1070_v17  ;;  %v1089_v29 = vmul.f32 %v2539_v28, %v1070_v17  ;;  %v1088_v35 = vmul.f32 %v2543_v41, %v1070_v17  ;;  %v2592_v38 = vmul.f32 %v1070_v17, %v2332_v2 }
 0x812   :  { %1934 = vmatmul.msk.f32.vlgmr.msra.gmra.mxu3 %vm103_vm0, %v1075_v18  ;;  %v2595_v20 = vmul.f32 %v1070_v17, %v2370_v40  ;;  %v2605_v43 = vmul.f32 %v1070_v17, %v2368_v39  ;;  %v2613_v16 = vmul.f32 %v1070_v17, %v2338_v4  ;;  %v1087_v44 = vmul.f32 %v2123_v24, %v1070_v17 }
 0x813   :  { %1374 = vmatpush.msrb.mxu3 %v2124_v54  ;;  %1937 = vmatpush.xpose.msk.msra.mxu0 %vm103_vm0, %v1084_v23 }
 0x814   :  { %1940 = vmatpush.xpose.msk.msra.mxu1 %vm103_vm0, %v1090_v25 }
 0x815   :  { %1375 = vmatpush.msrb.mxu3 %v2125_v48 }
 0x816   :  { %v1072_v31 = vpop.f32.mrf.mxu2 }
 0x817   :  { %1376 = vmatpush.msrb.mxu3 %v2126_v12  ;;  %v1073_v61 = vadd.f32 %v2057_v46, %v1072_v31  ;;  %1938 = vmatpush.xpose.msk.msra.mxu0 %vm103_vm0, %v1083_v58 }
 0x818   :  { %1941 = vmatpush.xpose.msk.msra.mxu1 %vm103_vm0, %v1089_v29 }
 0x819   :  { %1377 = vmatpush.msrb.mxu3 %v2127_v32  ;;  %v1094_v37 = vmul.f32 %v2120_v50, %v1073_v61  ;;  %v2599_v3 = vmul.f32 %v1073_v61, %v2332_v2  ;;  %v2602_v33 = vmul.f32 %v1073_v61, %v2370_v40  ;;  %v2608_v30 = vmul.f32 %v1073_v61, %v2368_v39  ;;  %v932_v50 = vld [vmem:[#allocation2 + $0x260] sm:$0x1] }
 0x81a   :  { %1939 = vmatmul.msk.f32.vlgmr.msra.gmra.mxu0 %vm103_vm0, %v1076_v10  ;;  %v2616_v27 = vmul.f32 %v1073_v61, %v2338_v4  ;;  %v1093_v26 = vmul.f32 %v2539_v28, %v1073_v61  ;;  %v1077_v4 = vmul.f32 %v1070_v17, %v910_v11  ;;  %v1092_v46 = vmul.f32 %v2543_v41, %v1073_v61 }
 0x81b   :  { %1945 = vmatpush.xpose.msk.msra.mxu2 %vm103_vm0, %v1094_v37  ;;  %v2028_v2 = vpack.i.bf16 %v2599_v3, %v2592_v38  ;;  %v2038_v40 = vpack.i.bf16 %v2602_v33, %v2595_v20  ;;  %v2043_v39 = vpack.i.bf16 %v2608_v30, %v2605_v43  ;;  %v1091_v47 = vmul.f32 %v2123_v24, %v1073_v61 }
 0x81c   :  { %1942 = vmatpush.xpose.msk.msra.mxu1 %vm103_vm0, %v1088_v35  ;;  %v2033_v45 = vpack.i.bf16 %v2616_v27, %v2613_v16  ;;  %v1078_v36 = vmul.f32 %v1073_v61, %v910_v11 }
 0x81f   :  { %1946 = vmatpush.xpose.msk.msra.mxu2 %vm103_vm0, %v1093_v26 }
 0x820   :  { %1943 = vmatpush.xpose.msk.msra.mxu1 %vm103_vm0, %v1087_v44 }
 0x823   :  { %1944 = vmatmul.msk.f32.vlgmr.msra.gmra.mxu1 %vm103_vm0, %v1077_v4  ;;  %1947 = vmatpush.xpose.msk.msra.mxu2 %vm103_vm0, %v1092_v46 }
 0x827   :  { %1948 = vmatpush.xpose.msk.msra.mxu2 %vm103_vm0, %v1091_v47 }
 0x82a   :  { %1949 = vmatmul.msk.f32.vlgmr.msra.gmra.mxu2 %vm103_vm0, %v1078_v36 }
 0x895   :  { %v1143_v34 = vpop.f32.mrf.mxu3 }
 0x896   :  { %v1251_v28 = vmul.f32 0.35355338, %v1143_v34 }
 0x897   :  { %v1178_v52 = vpop.f32.mrf.mxu0 }
 0x898   :  { %v2634_v53 = vadd.f32 %v1251_v28, %v932_v50  ;;  %v1252_v55 = vmul.f32 0.35355338, %v1178_v52 }
 0x89a   :  { %v2636_v41 = vadd.f32 %v1252_v55, %v932_v50  ;;  %v1277_v56 = vsel %vm1276_vm10, %v2634_v53, -inf  ;;  %v1260_v57 = vsel %vm1259_vm11, %v2634_v53, -inf  ;;  %v1294_v17 = vsel %vm1293_vm12, %v2634_v53, -inf }
 0x89b   :  { %1278 = vmax.xlane.f32.xlu2 %v1277_v56  ;;  %1261 = vmax.xlane.f32.xlu0 %v1260_v57  ;;  %v1311_v32 = vsel %vm1310_vm13, %v2634_v53, -inf }
 0x89c   :  { %v1263_v24 = vsel %vm1259_vm11, %v2636_v41, -inf  ;;  %v1280_v51 = vsel %vm1276_vm10, %v2636_v41, -inf  ;;  %v1297_v54 = vsel %vm1293_vm12, %v2636_v41, -inf  ;;  %v1314_v31 = vsel %vm1310_vm13, %v2636_v41, -inf }
 0x89d   :  { %1264 = vmax.xlane.f32.xlu1 %v1263_v24 }
 0x8a0   :  { %v1213_v49 = vpop.f32.mrf.mxu1 }
 0x8a1   :  { %v1253_v9 = vmul.f32 0.35355338, %v1213_v49 }
 0x8a3   :  { %v2644_v11 = vadd.f32 %v1253_v9, %v932_v50  ;;  %1281 = vmax.xlane.f32.xlu2 %v1280_v51  ;;  %1295 = vmax.xlane.f32.xlu0 %v1294_v17 }
 0x8a5   :  { %v1283_v18 = vsel %vm1276_vm10, %v2644_v11, -inf  ;;  %v1266_v23 = vsel %vm1259_vm11, %v2644_v11, -inf  ;;  %v1300_v25 = vsel %vm1293_vm12, %v2644_v11, -inf  ;;  %v1317_v10 = vsel %vm1310_vm13, %v2644_v11, -inf }
 0x8a6   :  { %1284 = vmax.xlane.f32.xlu1 %v1283_v18 }
 0x8ab   :  { %1298 = vmax.xlane.f32.xlu2 %v1297_v54  ;;  %1267 = vmax.xlane.f32.xlu0 %v1266_v23 }
 0x8ad   :  { %v1248_v48 = vpop.f32.mrf.mxu2 }
 0x8ae   :  { %1301 = vmax.xlane.f32.xlu1 %v1300_v25  ;;  %v1254_v58 = vmul.f32 0.35355338, %v1248_v48 }
 0x8b0   :  { %v2658_v29 = vadd.f32 %v1254_v58, %v932_v50 }
 0x8b2   :  { %v1286_v12 = vsel %vm1276_vm10, %v2658_v29, -inf  ;;  %v1269_v61 = vsel %vm1259_vm11, %v2658_v29, -inf  ;;  %v1303_v35 = vsel %vm1293_vm12, %v2658_v29, -inf  ;;  %v1320_v37 = vsel %vm1310_vm13, %v2658_v29, -inf }
 0x8b3   :  { %1315 = vmax.xlane.f32.xlu2 %v1314_v31  ;;  %1287 = vmax.xlane.f32.xlu0 %v1286_v12 }
 0x8b6   :  { %1270 = vmax.xlane.f32.xlu1 %v1269_v61 }
 0x8bb   :  { %1318 = vmax.xlane.f32.xlu2 %v1317_v10  ;;  %1312 = vmax.xlane.f32.xlu0 %v1311_v32 }
 0x8be   :  { %1304 = vmax.xlane.f32.xlu1 %v1303_v35 }
 0x8c6   :  { %1321 = vmax.xlane.f32.xlu1 %v1320_v37 }
 0x8cf   :  { %2014 = vrot.lane.b32.xlu0 %v2013_v21, %s2158_s1 }
 0x8d3   :  { %2009 = vrot.lane.b32.xlu2 %v2008_v1, %s2158_s1 }
 0x8d7   :  { %2024 = vrot.lane.b32.xlu0 %v2023_v7, %s2158_s1 }
 0x8db   :  { %2029 = vrot.lane.b32.xlu2 %v2028_v2, %s2158_s1 }
 0x8df   :  { %2019 = vrot.lane.b32.xlu1 %v2018_v13, %s2158_s1  ;;  %2039 = vrot.lane.b32.xlu0 %v2038_v40, %s2158_s1 }
 0x8e3   :  { %2044 = vrot.lane.b32.xlu2 %v2043_v39, %s2158_s1 }
 0x8e7   :  { %2034 = vrot.lane.b32.xlu1 %v2033_v45, %s2158_s1 }
 0x90e   :  { %v1262_v15 = vpop.xlane.xlu0 %1261  ;;  %v1279_v59 = vpop.xlane.xlu2 %1278 }
 0x90f   :  { %v1272_v3 = vsub.f32 %v2634_v53, %v1262_v15  ;;  %v1289_v30 = vsub.f32 %v2634_v53, %v1279_v59 }
 0x910   :  { %v1265_v60 = vpop.xlane.xlu1 %1264 }
 0x911   :  { %v1273_v16 = vsub.f32 %v2636_v41, %v1265_v60  ;;  %v1327_v50 = vsel %vm346_vm3, %v1272_v3, %v1289_v30 }
 0x916   :  { %v1296_v19 = vpop.xlane.xlu0 %1295  ;;  %v1282_v42 = vpop.xlane.xlu2 %1281 }
 0x917   :  { %v1290_v20 = vsub.f32 %v2636_v41, %v1282_v42  ;;  %v1306_v40 = vsub.f32 %v2634_v53, %v1296_v19 }
 0x919   :  { %v1285_v62 = vpop.xlane.xlu1 %1284  ;;  %v1328_v45 = vsel %vm346_vm3, %v1273_v16, %v1290_v20  ;;  %v1331_v52 = vsel %vm418_vm5, %v1327_v50, %v1306_v40 }
 0x91a   :  { %v1291_v33 = vsub.f32 %v2644_v11, %v1285_v62 }
 0x91e   :  { %v1268_v63 = vpop.xlane.xlu0 %1267  ;;  %v1299_v0 = vpop.xlane.xlu2 %1298 }
 0x91f   :  { %v1274_v38 = vsub.f32 %v2644_v11, %v1268_v63  ;;  %v1307_v43 = vsub.f32 %v2636_v41, %v1299_v0 }
 0x921   :  { %v1302_v21 = vpop.xlane.xlu1 %1301  ;;  %v1329_v39 = vsel %vm346_vm3, %v1274_v38, %v1291_v33  ;;  %v1332_v47 = vsel %vm418_vm5, %v1328_v45, %v1307_v43 }
 0x922   :  { %v1308_v27 = vsub.f32 %v2644_v11, %v1302_v21 }
 0x924   :  { %v1333_v34 = vsel %vm418_vm5, %v1329_v39, %v1308_v27 }
 0x926   :  { %v1288_v1 = vpop.xlane.xlu0 %1287  ;;  %v1316_v7 = vpop.xlane.xlu2 %1315 }
 0x927   :  { %v1324_v2 = vsub.f32 %v2636_v41, %v1316_v7 }
 0x929   :  { %v1271_v13 = vpop.xlane.xlu1 %1270  ;;  %v1336_v28 = vsel %vm423_vm6, %v1332_v47, %v1324_v2 }
 0x92a   :  { %v1341_v56 = vmul.f32 1.442695, %v1336_v28 }
 0x92c   :  { %2100 = vpow2.f32 %v1341_v56  ;;  %v913_v56 = vld [vmem:[#allocation2 + $0x1d8] sm:$0xff] }
 0x92e   :  { %v1313_v44 = vpop.xlane.xlu0 %1312  ;;  %v1319_v26 = vpop.xlane.xlu2 %1318 }
 0x92f   :  { %v1323_v4 = vsub.f32 %v2634_v53, %v1313_v44  ;;  %v1325_v46 = vsub.f32 %v2644_v11, %v1319_v26  ;;  %v1275_v53 = vsub.f32 %v2658_v29, %v1271_v13  ;;  %v1292_v11 = vsub.f32 %v2658_v29, %v1288_v1 }
 0x931   :  { %v1305_v36 = vpop.xlane.xlu1 %1304  ;;  %v1337_v55 = vsel %vm423_vm6, %v1333_v34, %v1325_v46  ;;  %v1335_v41 = vsel %vm423_vm6, %v1331_v52, %v1323_v4  ;;  %v1330_v54 = vsel %vm346_vm3, %v1275_v53, %v1292_v11  ;;  %vm1355_vm3 = vcmask 1042434   ;;  %v912_v53 = vld [vmem:[#allocation2 + $0x1d0] sm:$0xff] }
 0x932   :  { %v1343_v57 = vmul.f32 1.442695, %v1337_v55  ;;  %v1339_v24 = vmul.f32 1.442695, %v1335_v41  ;;  %v1309_v49 = vsub.f32 %v2658_v29, %v1305_v36  ;;  %v2101_v31 = vpop.eup %2100  ;;  %v914_v41 = vld [vmem:[#allocation2 + $0x1e0] sm:$0xff] }
 0x933   :  { %v1351_v35 = vrot.slane %v2101_v31, 7  ;;  %1578 = vmatpush.msrb.mxu2 %v914_v41 }
 0x934   :  { %2102 = vpow2.f32 %v1343_v57  ;;  %v1334_v25 = vsel %vm418_vm5, %v1330_v54, %v1309_v49  ;;  %vm1358_vm5 = vcmask 1043459   ;;  %v911_v57 = vld [vmem:[#allocation2 + $0x1c8] sm:$0xff] }
 0x935   :  { %2104 = vpow2.f32 %v1339_v24  ;;  %1579 = vmatpush.msrb.mxu2 %v913_v56 }
 0x936   :  { %v2010_v9 = vpop.permute.xlu2 %2009 }
 0x937   :  { %v2012_v51 = vunpack.i.h.bf16 %v2010_v9  ;;  %v2011_v17 = vunpack.i.l.bf16 %v2010_v9  ;;  %1580 = vmatpush.msrb.mxu2 %v912_v53  ;;  %v2059_v53 = vld [vmem:[#allocation2 + $0x1b8] ss:$0 sm:$0xff] }
 0x939   :  { %v1322_v18 = vpop.xlane.xlu1 %1321  ;;  %1428 = vmatpush.msrb.mxu0 %v2011_v17  ;;  %1467 = vmatpush.msra.mxu3 %v2012_v51 }
 0x93a   :  { %v1326_v23 = vsub.f32 %v2658_v29, %v1322_v18  ;;  %v2730_v61 = vpop.eup %2102  ;;  %1581 = vmatpush.msrb.mxu2 %v911_v57 }
 0x93b   :  { %v2105_v32 = vpop.eup %2104  ;;  %v1354_v59 = vrot.slane %v2730_v61, 6 }
 0x93c   :  { %v1338_v48 = vsel %vm423_vm6, %v1334_v25, %v1326_v23  ;;  %v1353_v60 = vsel %vm1352_vm14, %v1351_v35, %v2105_v32  ;;  %vm1609_vm6 = vcmask 257024  }
 0x93d   :  { %v1345_v58 = vmul.f32 1.442695, %v1338_v48  ;;  %v1356_v62 = vsel %vm1355_vm3, %v1354_v59, %v1353_v60  ;;  %v2058_v48 = vld [vmem:[#allocation2 + $0x1e8] ss:$0 sm:$0xff] }
 0x93e   :  { %v2030_v12 = vpop.permute.xlu2 %2029 }
 0x93f   :  { %2106 = vpow2.f32 %v1345_v58  ;;  %v2032_v10 = vunpack.i.h.bf16 %v2030_v12  ;;  %v2031_v20 = vunpack.i.l.bf16 %v2030_v12 }
 0x941   :  { %v2015_v37 = vpop.permute.xlu0 %2014  ;;  %1545 = vmatpush.msrb.mxu1 %v2032_v10 }
 0x942   :  { %v2017_v29 = vunpack.i.h.bf16 %v2015_v37  ;;  %v2016_v15 = vunpack.i.l.bf16 %v2015_v37 }
 0x944   :  { %1429 = vmatpush.msrb.mxu0 %v2016_v15  ;;  %1468 = vmatpush.msra.mxu3 %v2017_v29 }
 0x945   :  { %v2107_v19 = vpop.eup %2106 }
 0x946   :  { %v1357_v42 = vrot.slane %v2107_v19, 5  ;;  %v2045_v16 = vpop.permute.xlu2 %2044 }
 0x947   :  { %v2047_v40 = vunpack.i.h.bf16 %v2045_v16  ;;  %v2046_v39 = vunpack.i.l.bf16 %v2045_v16 }
 0x948   :  { %v1359_v63 = vsel %vm1358_vm5, %v1357_v42, %v1356_v62 }
 0x949   :  { %1950 = vmatmul.msk.f32.vlgmr.msrb.gmra.mxu3 %vm103_vm0, %v1359_v63  ;;  %v2025_v0 = vpop.permute.xlu0 %2024 }
 0x94a   :  { %v2027_v13 = vunpack.i.h.bf16 %v2025_v0  ;;  %v2026_v38 = vunpack.i.l.bf16 %v2025_v0 }
 0x951   :  { %v2020_v21 = vpop.permute.xlu1 %2019  ;;  %v2040_v3 = vpop.permute.xlu0 %2039 }
 0x952   :  { %v2022_v1 = vunpack.i.h.bf16 %v2020_v21  ;;  %v2021_v7 = vunpack.i.l.bf16 %v2020_v21  ;;  %v2042_v27 = vunpack.i.h.bf16 %v2040_v3  ;;  %v2041_v2 = vunpack.i.l.bf16 %v2040_v3 }
 0x954   :  { %1430 = vmatpush.msrb.mxu0 %v2021_v7  ;;  %1469 = vmatpush.msra.mxu3 %v2022_v1 }
 0x956   :  { %1431 = vmatpush.msrb.mxu0 %v2026_v38  ;;  %1470 = vmatpush.msra.mxu3 %v2027_v13 }
 0x958   :  { %1506 = vmatpush.msra.mxu0 %v2031_v20 }
 0x959   :  { %v2035_v33 = vpop.permute.xlu1 %2034 }
 0x95a   :  { %v2037_v43 = vunpack.i.h.bf16 %v2035_v33  ;;  %v2036_v30 = vunpack.i.l.bf16 %v2035_v33 }
 0x95c   :  { %1507 = vmatpush.msra.mxu0 %v2036_v30  ;;  %1546 = vmatpush.msrb.mxu1 %v2037_v43 }
 0x95e   :  { %1508 = vmatpush.msra.mxu0 %v2041_v2  ;;  %1547 = vmatpush.msrb.mxu1 %v2042_v27 }
 0x960   :  { %1509 = vmatpush.msra.mxu0 %v2046_v39  ;;  %1548 = vmatpush.msrb.mxu1 %v2047_v40 }
 0x9cc   :  { %v1379_v44 = vpop.f32.mrf.mxu3 }
 0x9cd   :  { %v1383_v26 = vrot.slane %v1379_v44, 1  ;;  %v1385_v45 = vrot.slane %v1379_v44, 3  ;;  %2108 = vrcp.f32 %v1379_v44  ;;  %v1384_v4 = vrot.slane %v1379_v44, 2  ;;  %v919_v44 = vld [vmem:[#allocation2 + $0x208] sm:$0xff] }
 0x9ce   :  { %1703 = vmatpush.msrb.mxu3 %v919_v44 }
 0x9cf   :  { %2110 = vrcp.f32 %v1383_v26  ;;  %v918_v26 = vld [vmem:[#allocation2 + $0x200] sm:$0xff] }
 0x9d0   :  { %2112 = vrcp.f32 %v1385_v45  ;;  %v917_v45 = vld [vmem:[#allocation2 + $0x1f8] sm:$0xff]  ;;  %1704 = vmatpush.msrb.mxu3 %v918_v26 }
 0x9d1   :  { %2114 = vrcp.f32 %v1384_v4  ;;  %v916_v4 = vld [vmem:[#allocation2 + $0x1f0] sm:$0xff] }
 0x9d2   :  { %1705 = vmatpush.msrb.mxu3 %v917_v45 }
 0x9d3   :  { %v2109_v46 = vpop.eup %2108 }
 0x9d4   :  { %v1393_v47 = vmul.f32 %v2109_v46, %v2105_v32  ;;  %1706 = vmatpush.msrb.mxu3 %v916_v4 }
 0x9d5   :  { %v2111_v36 = vpop.eup %2110 }
 0x9d6   :  { %1951 = vmatmul.msk.f32.vlgmr.msrb.gmra.mxu0 %vm103_vm0, %v1393_v47  ;;  %v1394_v50 = vmul.f32 %v2111_v36, %v2101_v31  ;;  %v2113_v34 = vpop.eup %2112 }
 0x9d7   :  { %v1396_v28 = vmul.f32 %v2113_v34, %v2107_v19  ;;  %v2115_v52 = vpop.eup %2114 }
 0x9d8   :  { %1952 = vmatmul.msk.f32.vlgmr.msra.gmra.mxu3 %vm103_vm0, %v1394_v50  ;;  %v1395_v55 = vmul.f32 %v2115_v52, %v2730_v61 }
 0x9d9   :  { %1954 = vmatmul.msk.f32.vlgmr.msrb.gmra.mxu1 %vm103_vm0, %v1396_v28 }
 0x9de   :  { %1953 = vmatmul.msk.f32.vlgmr.msra.gmra.mxu0 %vm103_vm0, %v1395_v55 }
 0xa53   :  { %v1433_v24 = vpop.f32.mrf.mxu0 }
 0xa56   :  { %v1550_v49 = vpop.f32.mrf.mxu1 }
 0xa57   :  { %v1562_v18 = vrot.slane %v1550_v49, 5 }
 0xa5b   :  { %v1472_v9 = vpop.f32.mrf.mxu3  ;;  %v1511_v11 = vpop.f32.mrf.mxu0 }
 0xa5c   :  { %v1558_v51 = vrot.slane %v1472_v9, 7  ;;  %v1560_v17 = vrot.slane %v1511_v11, 6 }
 0xa5e   :  { %v1559_v54 = vsel %vm1352_vm14, %v1558_v51, %v1433_v24 }
 0xa5f   :  { %v1561_v23 = vsel %vm1355_vm3, %v1560_v17, %v1559_v54 }
 0xa60   :  { %v1563_v25 = vsel %vm1358_vm5, %v1562_v18, %v1561_v23 }
 0xa61   :  { %1955 = vmatmul.msk.f32.vlgmr.msrb.gmra.mxu2 %vm103_vm0, %v1563_v25 }
 0xae4   :  { %v1583_v58 = vpop.f32.mrf.mxu2 }
 0xae5   :  { %v1584_v31 = vadd.f32 %v2058_v48, %v1583_v58  ;;  %v2060_v48 = vld [vmem:[#allocation2 + $0x1c0] ss:$0 sm:$0xff] }
 0xae7   :  { %v1587_v12 = vrot.slane %v1584_v31, 1  ;;  %v1588_v61 = vrot.slane %v1584_v31, 2  ;;  %v1589_v10 = vrot.slane %v1584_v31, 3  ;;  %v2756_v29 = vadd.f32 %v1584_v31, %v2484_v6 }
 0xae9   :  { %v2747_v32 = vadd.f32 %v1587_v12, %v2489_v8  ;;  %v2750_v35 = vadd.f32 %v1588_v61, %v2494_v14  ;;  %v2753_v37 = vadd.f32 %v1589_v10, %v2499_v22 }
 0xaeb   :  { %v1602_v15 = vrot.slane %v2747_v32, 7  ;;  %v1604_v59 = vrot.slane %v2750_v35, 6  ;;  %v1606_v19 = vrot.slane %v2753_v37, 5 }
 0xaed   :  { %v1603_v60 = vsel %vm1352_vm14, %v1602_v15, %v2756_v29 }
 0xaee   :  { %v1605_v8 = vsel %vm1355_vm3, %v1604_v59, %v1603_v60 }
 0xaef   :  { %v1607_v14 = vsel %vm1358_vm5, %v1606_v19, %v1605_v8 }
 0xaf0   :  { %v1610_v22 = vsel %vm1609_vm6, %v1607_v14, 0.0  ;;  %v928_v14 = vld [vmem:[#allocation2 + $0x250] sm:$0xff] }
 0xaf1   :  { %1611 = vadd.xlane.f32.xlu1 %v1610_v22  ;;  %v927_v22 = vld [vmem:[#allocation2 + $0x248] sm:$0xff]  ;;  %1729 = vmatpush.msrb.mxu0 %v928_v14 }
 0xaf3   :  { %1730 = vmatpush.msrb.mxu0 %v927_v22  ;;  %v2063_v22 = vld [vmem:[#allocation2 + $0x50] ss:$0 sm:$0xff] }
 0xb64   :  { %v1612_v42 = vpop.xlane.xlu1 %1611 }
 0xb65   :  { %v1613_v6 = vmul.f32 %v1612_v42, %v2438_v5  ;;  %v926_v42 = vld [vmem:[#allocation2 + $0x240] sm:$0xff] }
 0xb66   :  { %1731 = vmatpush.msrb.mxu0 %v926_v42 }
 0xb67   :  { %v1615_v62 = vrot.slane %v1613_v6, 1  ;;  %v1616_v63 = vrot.slane %v1613_v6, 2  ;;  %v1617_v0 = vrot.slane %v1613_v6, 3  ;;  %v1622_v21 = vsub.f32 %v2756_v29, %v1613_v6  ;;  %v925_v6 = vld [vmem:[#allocation2 + $0x238] sm:$0xff] }
 0xb68   :  { %1732 = vmatpush.msrb.mxu0 %v925_v6 }
 0xb69   :  { %v1623_v1 = vsub.f32 %v2747_v32, %v1615_v62  ;;  %v1624_v7 = vsub.f32 %v2750_v35, %v1616_v63  ;;  %v1625_v13 = vsub.f32 %v2753_v37, %v1617_v0  ;;  %v1626_v33 = vmul.f32 %v1622_v21, %v1622_v21  ;;  %v924_v62 = vld [vmem:[#allocation2 + $0x230] sm:$0xff]  ;;  %v923_v63 = vld [vmem:[#allocation2 + $0x228] sm:$0xff]  ;;  %v922_v0 = vld [vmem:[#allocation2 + $0x220] sm:$0xff] }
 0xb6a   :  { %1733 = vmatpush.msrb.mxu0 %v924_v62 }
 0xb6b   :  { %v1627_v38 = vmul.f32 %v1623_v1, %v1623_v1  ;;  %v1628_v20 = vmul.f32 %v1624_v7, %v1624_v7  ;;  %v1629_v3 = vmul.f32 %v1625_v13, %v1625_v13 }
 0xb6c   :  { %1734 = vmatpush.msrb.mxu0 %v923_v63 }
 0xb6d   :  { %v1634_v43 = vrot.slane %v1627_v38, 7  ;;  %v1636_v30 = vrot.slane %v1628_v20, 6  ;;  %v1638_v27 = vrot.slane %v1629_v3, 5  ;;  %v921_v38 = vld [vmem:[#allocation2 + $0x218] sm:$0xff] }
 0xb6e   :  { %1735 = vmatpush.msrb.mxu0 %v922_v0 }
 0xb6f   :  { %v1635_v16 = vsel %vm1352_vm14, %v1634_v43, %v1626_v33  ;;  %v2062_v33 = vld [vmem:[#allocation2 + $0x258] ss:$0 sm:$0xff] }
 0xb70   :  { %v1637_v2 = vsel %vm1355_vm3, %v1636_v30, %v1635_v16  ;;  %1736 = vmatpush.msrb.mxu0 %v921_v38 }
 0xb71   :  { %v1639_v40 = vsel %vm1358_vm5, %v1638_v27, %v1637_v2 }
 0xb72   :  { %v1641_v39 = vsel %vm1609_vm6, %v1639_v40, 0.0 }
 0xb73   :  { %1642 = vadd.xlane.f32.xlu0 %v1641_v39 }
 0xbe6   :  { %v1643_v46 = vpop.xlane.xlu0 %1642 }
 0xbe7   :  { %v1644_v47 = vmul.f32 %v1643_v46, %v2438_v5 }
 0xbe9   :  { %v1645_v36 = vadd.f32 1e-05, %v1644_v47 }
 0xbeb   :  { %2116 = vrsqrt.f32 %v1645_v36  ;;  %vm1652_vm1 = vweird.f32 %v1645_v36 }
 0xbf1   :  { %v2117_v50 = vpop.eup %2116 }
 0xbf2   :  { %v1647_v34 = vmul.f32 %v2117_v50, %v1645_v36  ;;  %vm1653_vm15 = vweird.f32 %v2117_v50 }
 0xbf3   :  { %vm1654_vm2 = vmor %vm1652_vm1, %vm1653_vm15 }
 0xbf4   :  { %v1648_v28 = vmul.f32 %v2117_v50, %v1647_v34 }
 0xbf6   :  { %v1649_v52 = vmul.f32 0.5, %v1648_v28 }
 0xbf8   :  { %v1650_v55 = vsub.f32 1.5, %v1649_v52 }
 0xbfa   :  { %v1651_v41 = vmul.f32 %v2117_v50, %v1650_v55 }
 0xbfc   :  { %v1655_v56 = vsel %vm1654_vm2, %v2117_v50, %v1651_v41 }
 0xbfd   :  { %v1657_v57 = vrot.slane %v1655_v56, 1  ;;  %v1658_v24 = vrot.slane %v1655_v56, 2  ;;  %v1659_v49 = vrot.slane %v1655_v56, 3  ;;  %v1664_v9 = vmul.f32 %v1655_v56, %v1622_v21  ;;  %v2061_v21 = vld [vmem:[#allocation2 + $0x210] ss:$0 sm:$0xff] }
 0xbff   :  { %v1665_v11 = vmul.f32 %v1657_v57, %v1623_v1  ;;  %v1666_v51 = vmul.f32 %v1658_v24, %v1624_v7  ;;  %v1667_v17 = vmul.f32 %v1659_v49, %v1625_v13  ;;  %v1669_v18 = vmul.f32 %v2059_v53, %v1664_v9 }
 0xc01   :  { %v1670_v54 = vmul.f32 %v2059_v53, %v1665_v11  ;;  %v1671_v23 = vmul.f32 %v2059_v53, %v1666_v51  ;;  %v1672_v25 = vmul.f32 %v2059_v53, %v1667_v17  ;;  %v1674_v61 = vadd.f32 %v2060_v48, %v1669_v18 }
 0xc03   :  { %v1675_v58 = vadd.f32 %v2060_v48, %v1670_v54  ;;  %v1676_v31 = vadd.f32 %v2060_v48, %v1671_v23  ;;  %v1677_v12 = vadd.f32 %v2060_v48, %v1672_v25  ;;  %v1758_v25 = vld [vmem:[#allocation2 + $0x78] sm:$0xff]  ;;  %v1757_v48 = vld [vmem:[#allocation2 + $0x70] sm:$0xff] }
 0xc04   :  { %1868 = vmatpush.msra.mxu1 %v1758_v25 }
 0xc05   :  { %v1683_v10 = vrot.slane %v1675_v58, 7  ;;  %v1685_v15 = vrot.slane %v1676_v31, 6  ;;  %v1687_v60 = vrot.slane %v1677_v12, 5  ;;  %v1756_v58 = vld [vmem:[#allocation2 + $0x68] sm:$0xff]  ;;  %v1755_v31 = vld [vmem:[#allocation2 + $0x60] sm:$0xff] }
 0xc06   :  { %1869 = vmatpush.msra.mxu1 %v1757_v48 }
 0xc07   :  { %v1684_v59 = vsel %vm1352_vm14, %v1683_v10, %v1674_v61 }
 0xc08   :  { %v1686_v19 = vsel %vm1355_vm3, %v1685_v15, %v1684_v59  ;;  %1870 = vmatpush.msra.mxu1 %v1756_v58 }
 0xc09   :  { %v1688_v8 = vsel %vm1358_vm5, %v1687_v60, %v1686_v19 }
 0xc0a   :  { %1956 = vmatmul.msk.f32.vlgmr.msrb.gmra.mxu3 %vm103_vm0, %v1688_v8  ;;  %1871 = vmatpush.msra.mxu1 %v1755_v31 }
 0xc8d   :  { %v1708_v1 = vpop.f32.mrf.mxu3 }
 0xc8e   :  { %v1709_v7 = vadd.f32 %v2061_v21, %v1708_v1 }
 0xc90   :  { %v1711_v13 = vmax.f32 %v1709_v7, 0.0 }
 0xc92   :  { %1713 = vrot.lane.b32.xlu2 %v1711_v13, %s2160_s18  ;;  %v2064_v13 = vld [vmem:[#allocation2 + $0x58] ss:$0 sm:$0xff] }
 0xcec   :  { %v1714_v20 = vpop.permute.xlu2 %1713 }
 0xced   :  { %v1716_v3 = vmul.f32 %v1714_v20, %v1709_v7 }
 0xcef   :  { %1957 = vmatmul.msk.f32.vlgmr.msrb.gmra.mxu0 %vm859_vm8, %v1716_v3 }
 0xd6c   :  { %v1738_v43 = vpop.f32.mrf.mxu0 }
 0xd6d   :  { %v1739_v30 = vadd.f32 %v2062_v33, %v1738_v43 }
 0xd6f   :  { %v1742_v16 = vrot.slane %v1739_v30, 1  ;;  %v1743_v27 = vrot.slane %v1739_v30, 2  ;;  %v1744_v2 = vrot.slane %v1739_v30, 3  ;;  %v1749_v26 = vadd.f32 %v1739_v30, %v2756_v29 }
 0xd71   :  { %v1750_v40 = vadd.f32 %v1742_v16, %v2747_v32  ;;  %v1751_v39 = vadd.f32 %v1743_v27, %v2750_v35  ;;  %v1752_v44 = vadd.f32 %v1744_v2, %v2753_v37 }
 0xd73   :  { %v1764_v45 = vrot.slane %v1750_v40, 7  ;;  %v1766_v4 = vrot.slane %v1751_v39, 6  ;;  %v1768_v47 = vrot.slane %v1752_v44, 5 }
 0xd75   :  { %v1765_v46 = vsel %vm1352_vm14, %v1764_v45, %v1749_v26 }
 0xd76   :  { %v1767_v36 = vsel %vm1355_vm3, %v1766_v4, %v1765_v46 }
 0xd77   :  { %v1769_v50 = vsel %vm1358_vm5, %v1768_v47, %v1767_v36  ;;  %v2065_v36 = vld [vmem:[#allocation2 + $0x80] ss:$0 sm:$0xff] }
 0xd78   :  { %v1771_v34 = vsel %vm1609_vm6, %v1769_v50, 0.0 }
 0xd79   :  { %1772 = vadd.xlane.f32.xlu2 %v1771_v34 }
 0xdec   :  { %v1773_v28 = vpop.xlane.xlu2 %1772 }
 0xded   :  { %v1774_v32 = vmul.f32 %v1773_v28, %v2438_v5 }
 0xdef   :  { %v1776_v35 = vrot.slane %v1774_v32, 1  ;;  %v1777_v52 = vrot.slane %v1774_v32, 2  ;;  %v1778_v37 = vrot.slane %v1774_v32, 3  ;;  %v1783_v55 = vsub.f32 %v1749_v26, %v1774_v32 }
 0xdf1   :  { %v1784_v29 = vsub.f32 %v1750_v40, %v1776_v35  ;;  %v1785_v41 = vsub.f32 %v1751_v39, %v1777_v52  ;;  %v1786_v56 = vsub.f32 %v1752_v44, %v1778_v37  ;;  %v1787_v49 = vmul.f32 %v1783_v55, %v1783_v55 }
 0xdf3   :  { %v1788_v53 = vmul.f32 %v1784_v29, %v1784_v29  ;;  %v1789_v57 = vmul.f32 %v1785_v41, %v1785_v41  ;;  %v1790_v24 = vmul.f32 %v1786_v56, %v1786_v56 }
 0xdf5   :  { %v1795_v9 = vrot.slane %v1788_v53, 7  ;;  %v1797_v11 = vrot.slane %v1789_v57, 6  ;;  %v1799_v17 = vrot.slane %v1790_v24, 5 }
 0xdf7   :  { %v1796_v51 = vsel %vm1352_vm14, %v1795_v9, %v1787_v49 }
 0xdf8   :  { %v1798_v18 = vsel %vm1355_vm3, %v1797_v11, %v1796_v51 }
 0xdf9   :  { %v1800_v54 = vsel %vm1358_vm5, %v1799_v17, %v1798_v18 }
 0xdfa   :  { %v1802_v23 = vsel %vm1609_vm6, %v1800_v54, 0.0 }
 0xdfb   :  { %1803 = vadd.xlane.f32.xlu1 %v1802_v23 }
 0xe6e   :  { %v1804_v12 = vpop.xlane.xlu1 %1803 }
 0xe6f   :  { %v1805_v61 = vmul.f32 %v1804_v12, %v2438_v5 }
 0xe71   :  { %v1806_v10 = vadd.f32 1e-05, %v1805_v61 }
 0xe73   :  { %2118 = vrsqrt.f32 %v1806_v10  ;;  %vm1813_vm4 = vweird.f32 %v1806_v10 }
 0xe79   :  { %v2119_v15 = vpop.eup %2118 }
 0xe7a   :  { %v1808_v59 = vmul.f32 %v2119_v15, %v1806_v10  ;;  %vm1814_vm8 = vweird.f32 %v2119_v15 }
 0xe7b   :  { %vm1815_vm7 = vmor %vm1813_vm4, %vm1814_vm8 }
 0xe7c   :  { %v1809_v60 = vmul.f32 %v2119_v15, %v1808_v59 }
 0xe7e   :  { %v1810_v19 = vmul.f32 0.5, %v1809_v60 }
 0xe80   :  { %v1811_v8 = vsub.f32 1.5, %v1810_v19 }
 0xe82   :  { %v1812_v14 = vmul.f32 %v2119_v15, %v1811_v8 }
 0xe84   :  { %v1816_v42 = vsel %vm1815_vm7, %v2119_v15, %v1812_v14 }
 0xe85   :  { %v1818_v6 = vrot.slane %v1816_v42, 1  ;;  %v1819_v62 = vrot.slane %v1816_v42, 2  ;;  %v1820_v63 = vrot.slane %v1816_v42, 3  ;;  %v1825_v0 = vmul.f32 %v1816_v42, %v1783_v55 }
 0xe87   :  { %v1826_v21 = vmul.f32 %v1818_v6, %v1784_v29  ;;  %v1827_v5 = vmul.f32 %v1819_v62, %v1785_v41  ;;  %v1828_v1 = vmul.f32 %v1820_v63, %v1786_v56  ;;  %v1830_v7 = vmul.f32 %v2063_v22, %v1825_v0 }
 0xe89   :  { %v1831_v38 = vmul.f32 %v2063_v22, %v1826_v21  ;;  %v1832_v20 = vmul.f32 %v2063_v22, %v1827_v5  ;;  %v1833_v3 = vmul.f32 %v2063_v22, %v1828_v1  ;;  %v1835_v33 = vadd.f32 %v2064_v13, %v1830_v7 }
 0xe8b   :  { %v1836_v43 = vadd.f32 %v2064_v13, %v1831_v38  ;;  %v1837_v30 = vadd.f32 %v2064_v13, %v1832_v20  ;;  %v1838_v16 = vadd.f32 %v2064_v13, %v1833_v3  ;;  %v1839_v39 = vmax.f32 %v1835_v33, 0.0 }
 0xe8d   :  { %v1840_v27 = vmax.f32 %v1836_v43, 0.0  ;;  %v1841_v2 = vmax.f32 %v1837_v30, 0.0  ;;  %v1842_v40 = vmax.f32 %v1838_v16, 0.0 }
 0xe8f   :  { %v1848_v44 = vrot.slane %v1840_v27, 7  ;;  %v1850_v26 = vrot.slane %v1841_v2, 6  ;;  %v1852_v4 = vrot.slane %v1842_v40, 5 }
 0xe91   :  { %v1849_v45 = vsel %vm1352_vm14, %v1848_v44, %v1839_v39 }
 0xe92   :  { %v1851_v46 = vsel %vm1355_vm3, %v1850_v26, %v1849_v45 }
 0xe93   :  { %v1853_v47 = vsel %vm1358_vm5, %v1852_v4, %v1851_v46 }
 0xe94   :  { %1958 = vmatmul.msk.f32.vlgmr.msra.gmra.mxu1 %vm103_vm0, %v1853_v47 }
 0xf11   :  { %v1873_v50 = vpop.f32.mrf.mxu1 }
 0xf12   :  { %v1874_v34 = vadd.f32 %v2065_v36, %v1873_v50 }
 0xf14   :  { %1876 = vst [vmem:[%s2805_s2] sm:$0xf] %v1874_v34 }
 0xf15   :  { %1881 = vsyncpa [#allocation3], 1 }

</bundles_post_ra>
